<compile_context>
chip_gen: v5e
topology: v5e:2x2
jax: 0.10.0
libtpu: 0.0.40
codegen_flags: <defaults>
</compile_context>

<pallas_src>
import functools

import jax
import jax.numpy as jnp
from jax import lax
from jax.experimental import pallas as pl
from jax.experimental.pallas import tpu as pltpu


# ---------------------------------------------------------------------------
# Deterministic parameter init (mirrors the module's __init__)
# ---------------------------------------------------------------------------
def _haar_filters(dtype=jnp.float32):
    """The 4 stationary Haar filters, shape (4, 2, 2)."""
    h = jnp.array([0.5, 0.5], dtype=dtype)
    g = jnp.array([0.5, -0.5], dtype=dtype)
    ll = jnp.outer(h, h)
    lh = jnp.outer(h, g)
    hl = jnp.outer(g, h)
    hh = jnp.outer(g, g)
    return jnp.stack([ll, lh, hl, hh], axis=0)


def _orthogonal(key, rows, cols, dtype=jnp.float32):
    """Mimics torch.nn.init.orthogonal_ on a (rows, cols) flattened tensor."""
    transpose = rows < cols
    shape = (cols, rows) if transpose else (rows, cols)
    a = jax.random.normal(key, shape, dtype)
    q, r = jnp.linalg.qr(a)
    q = q * jnp.sign(jnp.diagonal(r))[None, :]
    if transpose:
        q = q.T
    return q[:rows, :cols]


def init_analysis_weight(key, in_channels, num_filters, kernel_size=2,
                         dtype=jnp.float32):
    """Returns the grouped-conv weight in PyTorch layout (C*F, 1, k, k)."""
    kk = kernel_size * kernel_size
    # stand-in for the kaiming_uniform default init; mostly overwritten below
    w = 0.1 * jax.random.normal(key, (in_channels, num_filters, kk), dtype)
    if kernel_size == 2:
        haar = _haar_filters(dtype).reshape(4, 4)          # (4, kk)
        w = w.at[:, :4, :].set(haar[None, :, :])
    if num_filters > 4:
        rest = _orthogonal(jax.random.fold_in(key, 1),
                           in_channels, (num_filters - 4) * kk, dtype)
        w = w.at[:, 4:, :].set(rest.reshape(in_channels, num_filters - 4, kk))
    return w.reshape(in_channels * num_filters, 1, kernel_size, kernel_size)


# ---------------------------------------------------------------------------
# Pallas kernel: grouped 2x2 analysis conv for one (batch, H-tile) block
# ---------------------------------------------------------------------------
def _haar_analysis_kernel(x_ref, xup_ref, w_ref, coarse_ref, detail_ref, *,
                          num_filters, n_coarse):
    # x_ref      : (C, Ht, W)      current H-tile of one image
    # xup_ref    : (C, Ht, W)      previous H-tile (same tile for h == 0)
    # w_ref      : (C*F*4,)        SMEM, flattened 2x2 filters [w00,w01,w10,w11]
    # coarse_ref : (n_coarse, Ht, W)
    # detail_ref : (C*F - n_coarse, Ht, W)
    C, Ht, W = x_ref.shape
    F = num_filters
    h_idx = pl.program_id(1)

    # Padding / halo masks, computed once and reused for every channel.
    row0 = lax.broadcasted_iota(jnp.int32, (Ht, W), 0) == 0
    col0 = lax.broadcasted_iota(jnp.int32, (Ht, W), 1) == 0
    zero_row = jnp.zeros((1, W), dtype=x_ref.dtype)

    for c in range(C):
        x00 = x_ref[c]                                    # x[h, w]        (Ht, W)

        # Row above the tile: last row of the previous H-tile, or the zero pad
        # for the first tile (conv padding=1, top-left crop).
        halo = jnp.where(h_idx > 0, xup_ref[c, Ht - 1:Ht, :], zero_row)   # (1, W)
        xm0 = jnp.where(row0, jnp.broadcast_to(halo, (Ht, W)),
                        pltpu.roll(x00, 1, axis=0))       # x[h-1, w  ]
        x0m = jnp.where(col0, 0, pltpu.roll(x00, 1, axis=1))   # x[h,   w-1]
        xmm = jnp.where(col0, 0, pltpu.roll(xm0, 1, axis=1))   # x[h-1, w-1]

        # out[c*F+f, h, w] = w00*x[h-1,w-1] + w01*x[h-1,w]
        #                  + w10*x[h,  w-1] + w11*x[h,  w]
        # Scalar weights from SMEM (no lane-broadcast tensors); f32 accumulate;
        # each output channel is stored straight into its destination ref.
        for f in range(F):
            base = (c * F + f) * 4
            val = (w_ref[base + 0] * xmm + w_ref[base + 1] * xm0
                   + w_ref[base + 2] * x0m + w_ref[base + 3] * x00)
            o = c * F + f
            if o < n_coarse:
                coarse_ref[o] = val.astype(coarse_ref.dtype)
            else:
                detail_ref[o - n_coarse] = val.astype(detail_ref.dtype)


def _pick_tile_h(H, W, C, F, itemsize, tile_h, vmem_budget_bytes):
    """Largest multiple-of-8 divisor of H whose per-step VMEM cost fits budget."""
    if tile_h is not None:
        assert tile_h == H or (tile_h % 8 == 0 and H % tile_h == 0), \
            "tile_h must be a multiple of 8 dividing H (or equal H)"
        return tile_h
    bytes_per_row = W * (2 * 2 * C * itemsize        # x block + halo block, x2 bufs
                         + 2 * C * F * itemsize      # coarse + detail blocks, x2 bufs
                         + 4 * C * 4)                # in-kernel f32 taps
    max_rows = max(8, vmem_budget_bytes // bytes_per_row)
    if H <= max_rows or H % 8 != 0:
        return H
    best = 8
    t = 16
    while t <= min(H, max_rows):
        if H % t == 0:
            best = t
        t += 8
    return best


# ---------------------------------------------------------------------------
# Wrapper: forward pass of LearnableHaarSplitMerge
# ---------------------------------------------------------------------------
@functools.partial(jax.jit, static_argnames=("in_channels", "num_filters",
                                             "coarse_to_in_ch_ratio", "tile_h",
                                             "vmem_limit_bytes"))
def learnable_haar_split_merge_forward(x, weight, *, in_channels, num_filters,
                                       coarse_to_in_ch_ratio, tile_h=None,
                                       vmem_limit_bytes=48 * 1024 * 1024):
    B, C, H, W = x.shape
    assert C == in_channels
    F = num_filters
    n_coarse = in_channels * coarse_to_in_ch_ratio
    n_detail = C * F - n_coarse

    Ht = _pick_tile_h(H, W, C, F, x.dtype.itemsize, tile_h,
                      vmem_budget_bytes=vmem_limit_bytes // 2)
    assert H % Ht == 0
    nH = H // Ht

    w_flat = weight.astype(jnp.float32).reshape(C * F * 4)

    # TODO(synk): match_spatial_dims is not defined in the spec; we assume a
    # top-left crop coeffs[..., :H, :W] (so only top/left zero-padding matters).
    kernel = functools.partial(_haar_analysis_kernel, num_filters=F,
                               n_coarse=n_coarse)

    coarse, detail = pl.pallas_call(
        kernel,
        out_shape=(jax.ShapeDtypeStruct((B, n_coarse, H, W), x.dtype),
                   jax.ShapeDtypeStruct((B, n_detail, H, W), x.dtype)),
        grid_spec=pltpu.PrefetchScalarGridSpec(
            num_scalar_prefetch=0,
            grid=(B, nH),
            in_specs=[
                # current H-tile of one image (all channels)
                pl.BlockSpec((None, C, Ht, W), lambda b, h: (b, 0, h, 0)),
                # previous H-tile of the same image: supplies the 1-row halo
                # (clamped to tile 0; masked inside the kernel when h == 0).
                # A skinnier (8-row) halo block would cut this extra read to
                # ~8/Ht of the input; kept tile-sized for dtype robustness.
                pl.BlockSpec((None, C, Ht, W),
                             lambda b, h: (b, 0, jnp.maximum(h - 1, 0), 0)),
                # 96 filter taps, flattened, resident in SMEM
                pl.BlockSpec(memory_space=pltpu.MemorySpace.SMEM),
            ],
            out_specs=[
                pl.BlockSpec((None, n_coarse, Ht, W), lambda b, h: (b, 0, h, 0)),
                pl.BlockSpec((None, n_detail, Ht, W), lambda b, h: (b, 0, h, 0)),
            ],
        ),
        compiler_params=pltpu.CompilerParams(
            dimension_semantics=("parallel", "parallel"),
            vmem_limit_bytes=vmem_limit_bytes),
    )(x, x, w_flat)
    return coarse, detail


# ---------------------------------------------------------------------------
# Pure-JAX reference (lax grouped conv) for correctness check
# ---------------------------------------------------------------------------
def _reference_forward(x, weight, *, in_channels, num_filters,
                       coarse_to_in_ch_ratio):
    B, C, H, W = x.shape
    coeffs = lax.conv_general_dilated(
        x, weight, window_strides=(1, 1), padding=((1, 1), (1, 1)),
        dimension_numbers=("NCHW", "OIHW", "NCHW"),
        feature_group_count=C)
    coeffs = coeffs[:, :, :H, :W]            # match_spatial_dims (top-left crop)
    n_coarse = in_channels * coarse_to_in_ch_ratio
    return coeffs[:, :n_coarse], coeffs[:, n_coarse:]


if __name__ == "__main__":
    in_channels = 3
    num_filters = 8
    coarse_to_in_ch_ratio = 2
    kernel_size = 2
    B, H, W = 2, 16, 16

    key = jax.random.PRNGKey(0)
    kx, kw = jax.random.split(key)
    x = jax.random.normal(kx, (B, in_channels, H, W), jnp.float32)
    weight = init_analysis_weight(kw, in_channels, num_filters, kernel_size)

    # tile_h=8 -> two H-tiles per image so the interior-tile halo path (h > 0)
    # is exercised, not just the zero-padded first tile.
    x_coarse, x_detail = learnable_haar_split_merge_forward(
        x, weight, in_channels=in_channels, num_filters=num_filters,
        coarse_to_in_ch_ratio=coarse_to_in_ch_ratio, tile_h=8)
    jax.block_until_ready((x_coarse, x_detail))

    ref_coarse, ref_detail = _reference_forward(
        x, weight, in_channels=in_channels, num_filters=num_filters,
        coarse_to_in_ch_ratio=coarse_to_in_ch_ratio)

    assert x_coarse.shape == (B, in_channels * coarse_to_in_ch_ratio, H, W)
    assert x_detail.shape == (B, in_channels * (num_filters - coarse_to_in_ch_ratio), H, W)
    assert jnp.allclose(x_coarse, ref_coarse, atol=1e-5, rtol=1e-5)
    assert jnp.allclose(x_detail, ref_detail, atol=1e-5, rtol=1e-5)

    print("KERNEL_OK")
</pallas_src>

<mosaic_0001>
module attributes {stable_mosaic.version = 11 : i64} {
  func.func @_haar_analysis_kernel(%arg0: i32, %arg1: i32, %arg2: memref<1x3x8x16xf32, #tpu.memory_space<vmem>>, %arg3: memref<1x3x8x16xf32, #tpu.memory_space<vmem>>, %arg4: memref<96xf32, #tpu.memory_space<smem>>, %arg5: memref<1x6x8x16xf32, #tpu.memory_space<vmem>>, %arg6: memref<1x18x8x16xf32, #tpu.memory_space<vmem>>) attributes {dimension_semantics = [#tpu.dimension_semantics<parallel>, #tpu.dimension_semantics<parallel>], iteration_bounds = array<i64: 2, 2>, scalar_prefetch = 0 : i64, scratch_operands = 0 : i64, tpu.core_type = #tpu.core_type<tc>, window_params = [{transform_indices = @transform_0, window_bounds = array<i64: 1, 3, 8, 16>}, {transform_indices = @transform_1, window_bounds = array<i64: 1, 3, 8, 16>}, {transform_indices = @transform_2, window_bounds = array<i64: 96>}, {transform_indices = @transform_3, window_bounds = array<i64: 1, 6, 8, 16>}, {transform_indices = @transform_4, window_bounds = array<i64: 1, 18, 8, 16>}]} {
    %0 = tpu.iota {dimensions = array<i32: 0>} : vector<8x16xi32>
    %c0_i32 = arith.constant 0 : i32
    %1 = vector.broadcast %c0_i32 : i32 to vector<8x16xi32>
    %2 = arith.cmpi eq, %0, %1 : vector<8x16xi32>
    %3 = tpu.iota {dimensions = array<i32: 1>} : vector<8x16xi32>
    %c0_i32_0 = arith.constant 0 : i32
    %4 = vector.broadcast %c0_i32_0 : i32 to vector<8x16xi32>
    %5 = arith.cmpi eq, %3, %4 : vector<8x16xi32>
    %cst = arith.constant 0.000000e+00 : f32
    %6 = vector.broadcast %cst : f32 to vector<1x16xf32>
    %c0 = arith.constant 0 : index
    %c0_1 = arith.constant 0 : index
    %c0_2 = arith.constant 0 : index
    %c0_3 = arith.constant 0 : index
    %7 = vector.load %arg2[%c0, %c0_1, %c0_2, %c0_3] : memref<1x3x8x16xf32, #tpu.memory_space<vmem>>, vector<1x1x8x16xf32>
    %8 = vector.shape_cast %7 : vector<1x1x8x16xf32> to vector<8x16xf32>
    %c0_i32_4 = arith.constant 0 : i32
    %9 = arith.cmpi sgt, %arg1, %c0_i32_4 : i32
    %c0_5 = arith.constant 0 : index
    %c0_6 = arith.constant 0 : index
    %c7 = arith.constant 7 : index
    %c0_7 = arith.constant 0 : index
    %10 = vector.load %arg3[%c0_5, %c0_6, %c7, %c0_7] : memref<1x3x8x16xf32, #tpu.memory_space<vmem>>, vector<1x1x1x16xf32>
    %11 = vector.shape_cast %10 : vector<1x1x1x16xf32> to vector<1x16xf32>
    %12 = arith.select %9, %11, %6 : vector<1x16xf32>
    %13 = vector.shape_cast %12 : vector<1x16xf32> to vector<1x16xf32>
    %14 = vector.broadcast %13 : vector<1x16xf32> to vector<8x16xf32>
    %c1_i32 = arith.constant 1 : i32
    %15 = tpu.dynamic_rotate %8 by %c1_i32 dim 0 : vector<8x16xf32>, i32 -> vector<8x16xf32>
    %16 = arith.select %2, %14, %15 : vector<8x16xi1>, vector<8x16xf32>
    %c1_i32_8 = arith.constant 1 : i32
    %17 = tpu.dynamic_rotate %8 by %c1_i32_8 dim 1 : vector<8x16xf32>, i32 -> vector<8x16xf32>
    %c0_i32_9 = arith.constant 0 : i32
    %18 = arith.sitofp %c0_i32_9 : i32 to f32
    %19 = vector.broadcast %18 : f32 to vector<8x16xf32>
    %20 = arith.select %5, %19, %17 : vector<8x16xi1>, vector<8x16xf32>
    %c1_i32_10 = arith.constant 1 : i32
    %21 = tpu.dynamic_rotate %16 by %c1_i32_10 dim 1 : vector<8x16xf32>, i32 -> vector<8x16xf32>
    %c0_i32_11 = arith.constant 0 : i32
    %22 = arith.sitofp %c0_i32_11 : i32 to f32
    %23 = vector.broadcast %22 : f32 to vector<8x16xf32>
    %24 = arith.select %5, %23, %21 : vector<8x16xi1>, vector<8x16xf32>
    %c0_12 = arith.constant 0 : index
    %25 = memref.load %arg4[%c0_12] : memref<96xf32, #tpu.memory_space<smem>>
    %26 = vector.broadcast %25 : f32 to vector<8x16xf32>
    %27 = arith.mulf %26, %24 : vector<8x16xf32>
    %c1 = arith.constant 1 : index
    %28 = memref.load %arg4[%c1] : memref<96xf32, #tpu.memory_space<smem>>
    %29 = vector.broadcast %28 : f32 to vector<8x16xf32>
    %30 = arith.mulf %29, %16 : vector<8x16xf32>
    %31 = arith.addf %27, %30 : vector<8x16xf32>
    %c2 = arith.constant 2 : index
    %32 = memref.load %arg4[%c2] : memref<96xf32, #tpu.memory_space<smem>>
    %33 = vector.broadcast %32 : f32 to vector<8x16xf32>
    %34 = arith.mulf %33, %20 : vector<8x16xf32>
    %35 = arith.addf %31, %34 : vector<8x16xf32>
    %c3 = arith.constant 3 : index
    %36 = memref.load %arg4[%c3] : memref<96xf32, #tpu.memory_space<smem>>
    %37 = vector.broadcast %36 : f32 to vector<8x16xf32>
    %38 = arith.mulf %37, %8 : vector<8x16xf32>
    %39 = arith.addf %35, %38 : vector<8x16xf32>
    %c0_13 = arith.constant 0 : index
    %c0_14 = arith.constant 0 : index
    %c0_15 = arith.constant 0 : index
    %c0_16 = arith.constant 0 : index
    %40 = vector.load %arg5[%c0_13, %c0_14, %c0_15, %c0_16] : memref<1x6x8x16xf32, #tpu.memory_space<vmem>>, vector<1x1x8x16xf32>
    %41 = vector.shape_cast %40 : vector<1x1x8x16xf32> to vector<8x16xf32>
    %42 = vector.shape_cast %39 : vector<8x16xf32> to vector<1x1x8x16xf32>
    tpu.vector_store %arg5[%c0_13, %c0_14, %c0_15, %c0_16], %42 {strides = array<i32>} : memref<1x6x8x16xf32, #tpu.memory_space<vmem>>, vector<1x1x8x16xf32>,
    %c4 = arith.constant 4 : index
    %43 = memref.load %arg4[%c4] : memref<96xf32, #tpu.memory_space<smem>>
    %44 = vector.broadcast %43 : f32 to vector<8x16xf32>
    %45 = arith.mulf %44, %24 : vector<8x16xf32>
    %c5 = arith.constant 5 : index
    %46 = memref.load %arg4[%c5] : memref<96xf32, #tpu.memory_space<smem>>
    %47 = vector.broadcast %46 : f32 to vector<8x16xf32>
    %48 = arith.mulf %47, %16 : vector<8x16xf32>
    %49 = arith.addf %45, %48 : vector<8x16xf32>
    %c6 = arith.constant 6 : index
    %50 = memref.load %arg4[%c6] : memref<96xf32, #tpu.memory_space<smem>>
    %51 = vector.broadcast %50 : f32 to vector<8x16xf32>
    %52 = arith.mulf %51, %20 : vector<8x16xf32>
    %53 = arith.addf %49, %52 : vector<8x16xf32>
    %c7_17 = arith.constant 7 : index
    %54 = memref.load %arg4[%c7_17] : memref<96xf32, #tpu.memory_space<smem>>
    %55 = vector.broadcast %54 : f32 to vector<8x16xf32>
    %56 = arith.mulf %55, %8 : vector<8x16xf32>
    %57 = arith.addf %53, %56 : vector<8x16xf32>
    %c0_18 = arith.constant 0 : index
    %c1_19 = arith.constant 1 : index
    %c0_20 = arith.constant 0 : index
    %c0_21 = arith.constant 0 : index
    %58 = vector.load %arg5[%c0_18, %c1_19, %c0_20, %c0_21] : memref<1x6x8x16xf32, #tpu.memory_space<vmem>>, vector<1x1x8x16xf32>
    %59 = vector.shape_cast %58 : vector<1x1x8x16xf32> to vector<8x16xf32>
    %60 = vector.shape_cast %57 : vector<8x16xf32> to vector<1x1x8x16xf32>
    tpu.vector_store %arg5[%c0_18, %c1_19, %c0_20, %c0_21], %60 {strides = array<i32>} : memref<1x6x8x16xf32, #tpu.memory_space<vmem>>, vector<1x1x8x16xf32>,
    %c8 = arith.constant 8 : index
    %61 = memref.load %arg4[%c8] : memref<96xf32, #tpu.memory_space<smem>>
    %62 = vector.broadcast %61 : f32 to vector<8x16xf32>
    %63 = arith.mulf %62, %24 : vector<8x16xf32>
    %c9 = arith.constant 9 : index
    %64 = memref.load %arg4[%c9] : memref<96xf32, #tpu.memory_space<smem>>
    %65 = vector.broadcast %64 : f32 to vector<8x16xf32>
    %66 = arith.mulf %65, %16 : vector<8x16xf32>
    %67 = arith.addf %63, %66 : vector<8x16xf32>
    %c10 = arith.constant 10 : index
    %68 = memref.load %arg4[%c10] : memref<96xf32, #tpu.memory_space<smem>>
    %69 = vector.broadcast %68 : f32 to vector<8x16xf32>
    %70 = arith.mulf %69, %20 : vector<8x16xf32>
    %71 = arith.addf %67, %70 : vector<8x16xf32>
    %c11 = arith.constant 11 : index
    %72 = memref.load %arg4[%c11] : memref<96xf32, #tpu.memory_space<smem>>
    %73 = vector.broadcast %72 : f32 to vector<8x16xf32>
    %74 = arith.mulf %73, %8 : vector<8x16xf32>
    %75 = arith.addf %71, %74 : vector<8x16xf32>
    %c0_22 = arith.constant 0 : index
    %c2_23 = arith.constant 2 : index
    %c0_24 = arith.constant 0 : index
    %c0_25 = arith.constant 0 : index
    %76 = vector.load %arg5[%c0_22, %c2_23, %c0_24, %c0_25] : memref<1x6x8x16xf32, #tpu.memory_space<vmem>>, vector<1x1x8x16xf32>
    %77 = vector.shape_cast %76 : vector<1x1x8x16xf32> to vector<8x16xf32>
    %78 = vector.shape_cast %75 : vector<8x16xf32> to vector<1x1x8x16xf32>
    tpu.vector_store %arg5[%c0_22, %c2_23, %c0_24, %c0_25], %78 {strides = array<i32>} : memref<1x6x8x16xf32, #tpu.memory_space<vmem>>, vector<1x1x8x16xf32>,
    %c12 = arith.constant 12 : index
    %79 = memref.load %arg4[%c12] : memref<96xf32, #tpu.memory_space<smem>>
    %80 = vector.broadcast %79 : f32 to vector<8x16xf32>
    %81 = arith.mulf %80, %24 : vector<8x16xf32>
    %c13 = arith.constant 13 : index
    %82 = memref.load %arg4[%c13] : memref<96xf32, #tpu.memory_space<smem>>
    %83 = vector.broadcast %82 : f32 to vector<8x16xf32>
    %84 = arith.mulf %83, %16 : vector<8x16xf32>
    %85 = arith.addf %81, %84 : vector<8x16xf32>
    %c14 = arith.constant 14 : index
    %86 = memref.load %arg4[%c14] : memref<96xf32, #tpu.memory_space<smem>>
    %87 = vector.broadcast %86 : f32 to vector<8x16xf32>
    %88 = arith.mulf %87, %20 : vector<8x16xf32>
    %89 = arith.addf %85, %88 : vector<8x16xf32>
    %c15 = arith.constant 15 : index
    %90 = memref.load %arg4[%c15] : memref<96xf32, #tpu.memory_space<smem>>
    %91 = vector.broadcast %90 : f32 to vector<8x16xf32>
    %92 = arith.mulf %91, %8 : vector<8x16xf32>
    %93 = arith.addf %89, %92 : vector<8x16xf32>
    %c0_26 = arith.constant 0 : index
    %c3_27 = arith.constant 3 : index
    %c0_28 = arith.constant 0 : index
    %c0_29 = arith.constant 0 : index
    %94 = vector.load %arg5[%c0_26, %c3_27, %c0_28, %c0_29] : memref<1x6x8x16xf32, #tpu.memory_space<vmem>>, vector<1x1x8x16xf32>
    %95 = vector.shape_cast %94 : vector<1x1x8x16xf32> to vector<8x16xf32>
    %96 = vector.shape_cast %93 : vector<8x16xf32> to vector<1x1x8x16xf32>
    tpu.vector_store %arg5[%c0_26, %c3_27, %c0_28, %c0_29], %96 {strides = array<i32>} : memref<1x6x8x16xf32, #tpu.memory_space<vmem>>, vector<1x1x8x16xf32>,
    %c16 = arith.constant 16 : index
    %97 = memref.load %arg4[%c16] : memref<96xf32, #tpu.memory_space<smem>>
    %98 = vector.broadcast %97 : f32 to vector<8x16xf32>
    %99 = arith.mulf %98, %24 : vector<8x16xf32>
    %c17 = arith.constant 17 : index
    %100 = memref.load %arg4[%c17] : memref<96xf32, #tpu.memory_space<smem>>
    %101 = vector.broadcast %100 : f32 to vector<8x16xf32>
    %102 = arith.mulf %101, %16 : vector<8x16xf32>
    %103 = arith.addf %99, %102 : vector<8x16xf32>
    %c18 = arith.constant 18 : index
    %104 = memref.load %arg4[%c18] : memref<96xf32, #tpu.memory_space<smem>>
    %105 = vector.broadcast %104 : f32 to vector<8x16xf32>
    %106 = arith.mulf %105, %20 : vector<8x16xf32>
    %107 = arith.addf %103, %106 : vector<8x16xf32>
    %c19 = arith.constant 19 : index
    %108 = memref.load %arg4[%c19] : memref<96xf32, #tpu.memory_space<smem>>
    %109 = vector.broadcast %108 : f32 to vector<8x16xf32>
    %110 = arith.mulf %109, %8 : vector<8x16xf32>
    %111 = arith.addf %107, %110 : vector<8x16xf32>
    %c0_30 = arith.constant 0 : index
    %c4_31 = arith.constant 4 : index
    %c0_32 = arith.constant 0 : index
    %c0_33 = arith.constant 0 : index
    %112 = vector.load %arg5[%c0_30, %c4_31, %c0_32, %c0_33] : memref<1x6x8x16xf32, #tpu.memory_space<vmem>>, vector<1x1x8x16xf32>
    %113 = vector.shape_cast %112 : vector<1x1x8x16xf32> to vector<8x16xf32>
    %114 = vector.shape_cast %111 : vector<8x16xf32> to vector<1x1x8x16xf32>
    tpu.vector_store %arg5[%c0_30, %c4_31, %c0_32, %c0_33], %114 {strides = array<i32>} : memref<1x6x8x16xf32, #tpu.memory_space<vmem>>, vector<1x1x8x16xf32>,
    %c20 = arith.constant 20 : index
    %115 = memref.load %arg4[%c20] : memref<96xf32, #tpu.memory_space<smem>>
    %116 = vector.broadcast %115 : f32 to vector<8x16xf32>
    %117 = arith.mulf %116, %24 : vector<8x16xf32>
    %c21 = arith.constant 21 : index
    %118 = memref.load %arg4[%c21] : memref<96xf32, #tpu.memory_space<smem>>
    %119 = vector.broadcast %118 : f32 to vector<8x16xf32>
    %120 = arith.mulf %119, %16 : vector<8x16xf32>
    %121 = arith.addf %117, %120 : vector<8x16xf32>
    %c22 = arith.constant 22 : index
    %122 = memref.load %arg4[%c22] : memref<96xf32, #tpu.memory_space<smem>>
    %123 = vector.broadcast %122 : f32 to vector<8x16xf32>
    %124 = arith.mulf %123, %20 : vector<8x16xf32>
    %125 = arith.addf %121, %124 : vector<8x16xf32>
    %c23 = arith.constant 23 : index
    %126 = memref.load %arg4[%c23] : memref<96xf32, #tpu.memory_space<smem>>
    %127 = vector.broadcast %126 : f32 to vector<8x16xf32>
    %128 = arith.mulf %127, %8 : vector<8x16xf32>
    %129 = arith.addf %125, %128 : vector<8x16xf32>
    %c0_34 = arith.constant 0 : index
    %c5_35 = arith.constant 5 : index
    %c0_36 = arith.constant 0 : index
    %c0_37 = arith.constant 0 : index
    %130 = vector.load %arg5[%c0_34, %c5_35, %c0_36, %c0_37] : memref<1x6x8x16xf32, #tpu.memory_space<vmem>>, vector<1x1x8x16xf32>
    %131 = vector.shape_cast %130 : vector<1x1x8x16xf32> to vector<8x16xf32>
    %132 = vector.shape_cast %129 : vector<8x16xf32> to vector<1x1x8x16xf32>
    tpu.vector_store %arg5[%c0_34, %c5_35, %c0_36, %c0_37], %132 {strides = array<i32>} : memref<1x6x8x16xf32, #tpu.memory_space<vmem>>, vector<1x1x8x16xf32>,
    %c24 = arith.constant 24 : index
    %133 = memref.load %arg4[%c24] : memref<96xf32, #tpu.memory_space<smem>>
    %134 = vector.broadcast %133 : f32 to vector<8x16xf32>
    %135 = arith.mulf %134, %24 : vector<8x16xf32>
    %c25 = arith.constant 25 : index
    %136 = memref.load %arg4[%c25] : memref<96xf32, #tpu.memory_space<smem>>
    %137 = vector.broadcast %136 : f32 to vector<8x16xf32>
    %138 = arith.mulf %137, %16 : vector<8x16xf32>
    %139 = arith.addf %135, %138 : vector<8x16xf32>
    %c26 = arith.constant 26 : index
    %140 = memref.load %arg4[%c26] : memref<96xf32, #tpu.memory_space<smem>>
    %141 = vector.broadcast %140 : f32 to vector<8x16xf32>
    %142 = arith.mulf %141, %20 : vector<8x16xf32>
    %143 = arith.addf %139, %142 : vector<8x16xf32>
    %c27 = arith.constant 27 : index
    %144 = memref.load %arg4[%c27] : memref<96xf32, #tpu.memory_space<smem>>
    %145 = vector.broadcast %144 : f32 to vector<8x16xf32>
    %146 = arith.mulf %145, %8 : vector<8x16xf32>
    %147 = arith.addf %143, %146 : vector<8x16xf32>
    %c0_38 = arith.constant 0 : index
    %c0_39 = arith.constant 0 : index
    %c0_40 = arith.constant 0 : index
    %c0_41 = arith.constant 0 : index
    %148 = vector.load %arg6[%c0_38, %c0_39, %c0_40, %c0_41] : memref<1x18x8x16xf32, #tpu.memory_space<vmem>>, vector<1x1x8x16xf32>
    %149 = vector.shape_cast %148 : vector<1x1x8x16xf32> to vector<8x16xf32>
    %150 = vector.shape_cast %147 : vector<8x16xf32> to vector<1x1x8x16xf32>
    tpu.vector_store %arg6[%c0_38, %c0_39, %c0_40, %c0_41], %150 {strides = array<i32>} : memref<1x18x8x16xf32, #tpu.memory_space<vmem>>, vector<1x1x8x16xf32>,
    %c28 = arith.constant 28 : index
    %151 = memref.load %arg4[%c28] : memref<96xf32, #tpu.memory_space<smem>>
    %152 = vector.broadcast %151 : f32 to vector<8x16xf32>
    %153 = arith.mulf %152, %24 : vector<8x16xf32>
    %c29 = arith.constant 29 : index
    %154 = memref.load %arg4[%c29] : memref<96xf32, #tpu.memory_space<smem>>
    %155 = vector.broadcast %154 : f32 to vector<8x16xf32>
    %156 = arith.mulf %155, %16 : vector<8x16xf32>
    %157 = arith.addf %153, %156 : vector<8x16xf32>
    %c30 = arith.constant 30 : index
    %158 = memref.load %arg4[%c30] : memref<96xf32, #tpu.memory_space<smem>>
    %159 = vector.broadcast %158 : f32 to vector<8x16xf32>
    %160 = arith.mulf %159, %20 : vector<8x16xf32>
    %161 = arith.addf %157, %160 : vector<8x16xf32>
    %c31 = arith.constant 31 : index
    %162 = memref.load %arg4[%c31] : memref<96xf32, #tpu.memory_space<smem>>
    %163 = vector.broadcast %162 : f32 to vector<8x16xf32>
    %164 = arith.mulf %163, %8 : vector<8x16xf32>
    %165 = arith.addf %161, %164 : vector<8x16xf32>
    %c0_42 = arith.constant 0 : index
    %c1_43 = arith.constant 1 : index
    %c0_44 = arith.constant 0 : index
    %c0_45 = arith.constant 0 : index
    %166 = vector.load %arg6[%c0_42, %c1_43, %c0_44, %c0_45] : memref<1x18x8x16xf32, #tpu.memory_space<vmem>>, vector<1x1x8x16xf32>
    %167 = vector.shape_cast %166 : vector<1x1x8x16xf32> to vector<8x16xf32>
    %168 = vector.shape_cast %165 : vector<8x16xf32> to vector<1x1x8x16xf32>
    tpu.vector_store %arg6[%c0_42, %c1_43, %c0_44, %c0_45], %168 {strides = array<i32>} : memref<1x18x8x16xf32, #tpu.memory_space<vmem>>, vector<1x1x8x16xf32>,
    %c0_46 = arith.constant 0 : index
    %c1_47 = arith.constant 1 : index
    %c0_48 = arith.constant 0 : index
    %c0_49 = arith.constant 0 : index
    %169 = vector.load %arg2[%c0_46, %c1_47, %c0_48, %c0_49] : memref<1x3x8x16xf32, #tpu.memory_space<vmem>>, vector<1x1x8x16xf32>
    %170 = vector.shape_cast %169 : vector<1x1x8x16xf32> to vector<8x16xf32>
    %c0_i32_50 = arith.constant 0 : i32
    %171 = arith.cmpi sgt, %arg1, %c0_i32_50 : i32
    %c0_51 = arith.constant 0 : index
    %c1_52 = arith.constant 1 : index
    %c7_53 = arith.constant 7 : index
    %c0_54 = arith.constant 0 : index
    %172 = vector.load %arg3[%c0_51, %c1_52, %c7_53, %c0_54] : memref<1x3x8x16xf32, #tpu.memory_space<vmem>>, vector<1x1x1x16xf32>
    %173 = vector.shape_cast %172 : vector<1x1x1x16xf32> to vector<1x16xf32>
    %174 = arith.select %171, %173, %6 : vector<1x16xf32>
    %175 = vector.shape_cast %174 : vector<1x16xf32> to vector<1x16xf32>
    %176 = vector.broadcast %175 : vector<1x16xf32> to vector<8x16xf32>
    %c1_i32_55 = arith.constant 1 : i32
    %177 = tpu.dynamic_rotate %170 by %c1_i32_55 dim 0 : vector<8x16xf32>, i32 -> vector<8x16xf32>
    %178 = arith.select %2, %176, %177 : vector<8x16xi1>, vector<8x16xf32>
    %c1_i32_56 = arith.constant 1 : i32
    %179 = tpu.dynamic_rotate %170 by %c1_i32_56 dim 1 : vector<8x16xf32>, i32 -> vector<8x16xf32>
    %c0_i32_57 = arith.constant 0 : i32
    %180 = arith.sitofp %c0_i32_57 : i32 to f32
    %181 = vector.broadcast %180 : f32 to vector<8x16xf32>
    %182 = arith.select %5, %181, %179 : vector<8x16xi1>, vector<8x16xf32>
    %c1_i32_58 = arith.constant 1 : i32
    %183 = tpu.dynamic_rotate %178 by %c1_i32_58 dim 1 : vector<8x16xf32>, i32 -> vector<8x16xf32>
    %c0_i32_59 = arith.constant 0 : i32
    %184 = arith.sitofp %c0_i32_59 : i32 to f32
    %185 = vector.broadcast %184 : f32 to vector<8x16xf32>
    %186 = arith.select %5, %185, %183 : vector<8x16xi1>, vector<8x16xf32>
    %c32 = arith.constant 32 : index
    %187 = memref.load %arg4[%c32] : memref<96xf32, #tpu.memory_space<smem>>
    %188 = vector.broadcast %187 : f32 to vector<8x16xf32>
    %189 = arith.mulf %188, %186 : vector<8x16xf32>
    %c33 = arith.constant 33 : index
    %190 = memref.load %arg4[%c33] : memref<96xf32, #tpu.memory_space<smem>>
    %191 = vector.broadcast %190 : f32 to vector<8x16xf32>
    %192 = arith.mulf %191, %178 : vector<8x16xf32>
    %193 = arith.addf %189, %192 : vector<8x16xf32>
    %c34 = arith.constant 34 : index
    %194 = memref.load %arg4[%c34] : memref<96xf32, #tpu.memory_space<smem>>
    %195 = vector.broadcast %194 : f32 to vector<8x16xf32>
    %196 = arith.mulf %195, %182 : vector<8x16xf32>
    %197 = arith.addf %193, %196 : vector<8x16xf32>
    %c35 = arith.constant 35 : index
    %198 = memref.load %arg4[%c35] : memref<96xf32, #tpu.memory_space<smem>>
    %199 = vector.broadcast %198 : f32 to vector<8x16xf32>
    %200 = arith.mulf %199, %170 : vector<8x16xf32>
    %201 = arith.addf %197, %200 : vector<8x16xf32>
    %c0_60 = arith.constant 0 : index
    %c2_61 = arith.constant 2 : index
    %c0_62 = arith.constant 0 : index
    %c0_63 = arith.constant 0 : index
    %202 = vector.load %arg6[%c0_60, %c2_61, %c0_62, %c0_63] : memref<1x18x8x16xf32, #tpu.memory_space<vmem>>, vector<1x1x8x16xf32>
    %203 = vector.shape_cast %202 : vector<1x1x8x16xf32> to vector<8x16xf32>
    %204 = vector.shape_cast %201 : vector<8x16xf32> to vector<1x1x8x16xf32>
    tpu.vector_store %arg6[%c0_60, %c2_61, %c0_62, %c0_63], %204 {strides = array<i32>} : memref<1x18x8x16xf32, #tpu.memory_space<vmem>>, vector<1x1x8x16xf32>,
    %c36 = arith.constant 36 : index
    %205 = memref.load %arg4[%c36] : memref<96xf32, #tpu.memory_space<smem>>
    %206 = vector.broadcast %205 : f32 to vector<8x16xf32>
    %207 = arith.mulf %206, %186 : vector<8x16xf32>
    %c37 = arith.constant 37 : index
    %208 = memref.load %arg4[%c37] : memref<96xf32, #tpu.memory_space<smem>>
    %209 = vector.broadcast %208 : f32 to vector<8x16xf32>
    %210 = arith.mulf %209, %178 : vector<8x16xf32>
    %211 = arith.addf %207, %210 : vector<8x16xf32>
    %c38 = arith.constant 38 : index
    %212 = memref.load %arg4[%c38] : memref<96xf32, #tpu.memory_space<smem>>
    %213 = vector.broadcast %212 : f32 to vector<8x16xf32>
    %214 = arith.mulf %213, %182 : vector<8x16xf32>
    %215 = arith.addf %211, %214 : vector<8x16xf32>
    %c39 = arith.constant 39 : index
    %216 = memref.load %arg4[%c39] : memref<96xf32, #tpu.memory_space<smem>>
    %217 = vector.broadcast %216 : f32 to vector<8x16xf32>
    %218 = arith.mulf %217, %170 : vector<8x16xf32>
    %219 = arith.addf %215, %218 : vector<8x16xf32>
    %c0_64 = arith.constant 0 : index
    %c3_65 = arith.constant 3 : index
    %c0_66 = arith.constant 0 : index
    %c0_67 = arith.constant 0 : index
    %220 = vector.load %arg6[%c0_64, %c3_65, %c0_66, %c0_67] : memref<1x18x8x16xf32, #tpu.memory_space<vmem>>, vector<1x1x8x16xf32>
    %221 = vector.shape_cast %220 : vector<1x1x8x16xf32> to vector<8x16xf32>
    %222 = vector.shape_cast %219 : vector<8x16xf32> to vector<1x1x8x16xf32>
    tpu.vector_store %arg6[%c0_64, %c3_65, %c0_66, %c0_67], %222 {strides = array<i32>} : memref<1x18x8x16xf32, #tpu.memory_space<vmem>>, vector<1x1x8x16xf32>,
    %c40 = arith.constant 40 : index
    %223 = memref.load %arg4[%c40] : memref<96xf32, #tpu.memory_space<smem>>
    %224 = vector.broadcast %223 : f32 to vector<8x16xf32>
    %225 = arith.mulf %224, %186 : vector<8x16xf32>
    %c41 = arith.constant 41 : index
    %226 = memref.load %arg4[%c41] : memref<96xf32, #tpu.memory_space<smem>>
    %227 = vector.broadcast %226 : f32 to vector<8x16xf32>
    %228 = arith.mulf %227, %178 : vector<8x16xf32>
    %229 = arith.addf %225, %228 : vector<8x16xf32>
    %c42 = arith.constant 42 : index
    %230 = memref.load %arg4[%c42] : memref<96xf32, #tpu.memory_space<smem>>
    %231 = vector.broadcast %230 : f32 to vector<8x16xf32>
    %232 = arith.mulf %231, %182 : vector<8x16xf32>
    %233 = arith.addf %229, %232 : vector<8x16xf32>
    %c43 = arith.constant 43 : index
    %234 = memref.load %arg4[%c43] : memref<96xf32, #tpu.memory_space<smem>>
    %235 = vector.broadcast %234 : f32 to vector<8x16xf32>
    %236 = arith.mulf %235, %170 : vector<8x16xf32>
    %237 = arith.addf %233, %236 : vector<8x16xf32>
    %c0_68 = arith.constant 0 : index
    %c4_69 = arith.constant 4 : index
    %c0_70 = arith.constant 0 : index
    %c0_71 = arith.constant 0 : index
    %238 = vector.load %arg6[%c0_68, %c4_69, %c0_70, %c0_71] : memref<1x18x8x16xf32, #tpu.memory_space<vmem>>, vector<1x1x8x16xf32>
    %239 = vector.shape_cast %238 : vector<1x1x8x16xf32> to vector<8x16xf32>
    %240 = vector.shape_cast %237 : vector<8x16xf32> to vector<1x1x8x16xf32>
    tpu.vector_store %arg6[%c0_68, %c4_69, %c0_70, %c0_71], %240 {strides = array<i32>} : memref<1x18x8x16xf32, #tpu.memory_space<vmem>>, vector<1x1x8x16xf32>,
    %c44 = arith.constant 44 : index
    %241 = memref.load %arg4[%c44] : memref<96xf32, #tpu.memory_space<smem>>
    %242 = vector.broadcast %241 : f32 to vector<8x16xf32>
    %243 = arith.mulf %242, %186 : vector<8x16xf32>
    %c45 = arith.constant 45 : index
    %244 = memref.load %arg4[%c45] : memref<96xf32, #tpu.memory_space<smem>>
    %245 = vector.broadcast %244 : f32 to vector<8x16xf32>
    %246 = arith.mulf %245, %178 : vector<8x16xf32>
    %247 = arith.addf %243, %246 : vector<8x16xf32>
    %c46 = arith.constant 46 : index
    %248 = memref.load %arg4[%c46] : memref<96xf32, #tpu.memory_space<smem>>
    %249 = vector.broadcast %248 : f32 to vector<8x16xf32>
    %250 = arith.mulf %249, %182 : vector<8x16xf32>
    %251 = arith.addf %247, %250 : vector<8x16xf32>
    %c47 = arith.constant 47 : index
    %252 = memref.load %arg4[%c47] : memref<96xf32, #tpu.memory_space<smem>>
    %253 = vector.broadcast %252 : f32 to vector<8x16xf32>
    %254 = arith.mulf %253, %170 : vector<8x16xf32>
    %255 = arith.addf %251, %254 : vector<8x16xf32>
    %c0_72 = arith.constant 0 : index
    %c5_73 = arith.constant 5 : index
    %c0_74 = arith.constant 0 : index
    %c0_75 = arith.constant 0 : index
    %256 = vector.load %arg6[%c0_72, %c5_73, %c0_74, %c0_75] : memref<1x18x8x16xf32, #tpu.memory_space<vmem>>, vector<1x1x8x16xf32>
    %257 = vector.shape_cast %256 : vector<1x1x8x16xf32> to vector<8x16xf32>
    %258 = vector.shape_cast %255 : vector<8x16xf32> to vector<1x1x8x16xf32>
    tpu.vector_store %arg6[%c0_72, %c5_73, %c0_74, %c0_75], %258 {strides = array<i32>} : memref<1x18x8x16xf32, #tpu.memory_space<vmem>>, vector<1x1x8x16xf32>,
    %c48 = arith.constant 48 : index
    %259 = memref.load %arg4[%c48] : memref<96xf32, #tpu.memory_space<smem>>
    %260 = vector.broadcast %259 : f32 to vector<8x16xf32>
    %261 = arith.mulf %260, %186 : vector<8x16xf32>
    %c49 = arith.constant 49 : index
    %262 = memref.load %arg4[%c49] : memref<96xf32, #tpu.memory_space<smem>>
    %263 = vector.broadcast %262 : f32 to vector<8x16xf32>
    %264 = arith.mulf %263, %178 : vector<8x16xf32>
    %265 = arith.addf %261, %264 : vector<8x16xf32>
    %c50 = arith.constant 50 : index
    %266 = memref.load %arg4[%c50] : memref<96xf32, #tpu.memory_space<smem>>
    %267 = vector.broadcast %266 : f32 to vector<8x16xf32>
    %268 = arith.mulf %267, %182 : vector<8x16xf32>
    %269 = arith.addf %265, %268 : vector<8x16xf32>
    %c51 = arith.constant 51 : index
    %270 = memref.load %arg4[%c51] : memref<96xf32, #tpu.memory_space<smem>>
    %271 = vector.broadcast %270 : f32 to vector<8x16xf32>
    %272 = arith.mulf %271, %170 : vector<8x16xf32>
    %273 = arith.addf %269, %272 : vector<8x16xf32>
    %c0_76 = arith.constant 0 : index
    %c6_77 = arith.constant 6 : index
    %c0_78 = arith.constant 0 : index
    %c0_79 = arith.constant 0 : index
    %274 = vector.load %arg6[%c0_76, %c6_77, %c0_78, %c0_79] : memref<1x18x8x16xf32, #tpu.memory_space<vmem>>, vector<1x1x8x16xf32>
    %275 = vector.shape_cast %274 : vector<1x1x8x16xf32> to vector<8x16xf32>
    %276 = vector.shape_cast %273 : vector<8x16xf32> to vector<1x1x8x16xf32>
    tpu.vector_store %arg6[%c0_76, %c6_77, %c0_78, %c0_79], %276 {strides = array<i32>} : memref<1x18x8x16xf32, #tpu.memory_space<vmem>>, vector<1x1x8x16xf32>,
    %c52 = arith.constant 52 : index
    %277 = memref.load %arg4[%c52] : memref<96xf32, #tpu.memory_space<smem>>
    %278 = vector.broadcast %277 : f32 to vector<8x16xf32>
    %279 = arith.mulf %278, %186 : vector<8x16xf32>
    %c53 = arith.constant 53 : index
    %280 = memref.load %arg4[%c53] : memref<96xf32, #tpu.memory_space<smem>>
    %281 = vector.broadcast %280 : f32 to vector<8x16xf32>
    %282 = arith.mulf %281, %178 : vector<8x16xf32>
    %283 = arith.addf %279, %282 : vector<8x16xf32>
    %c54 = arith.constant 54 : index
    %284 = memref.load %arg4[%c54] : memref<96xf32, #tpu.memory_space<smem>>
    %285 = vector.broadcast %284 : f32 to vector<8x16xf32>
    %286 = arith.mulf %285, %182 : vector<8x16xf32>
    %287 = arith.addf %283, %286 : vector<8x16xf32>
    %c55 = arith.constant 55 : index
    %288 = memref.load %arg4[%c55] : memref<96xf32, #tpu.memory_space<smem>>
    %289 = vector.broadcast %288 : f32 to vector<8x16xf32>
    %290 = arith.mulf %289, %170 : vector<8x16xf32>
    %291 = arith.addf %287, %290 : vector<8x16xf32>
    %c0_80 = arith.constant 0 : index
    %c7_81 = arith.constant 7 : index
    %c0_82 = arith.constant 0 : index
    %c0_83 = arith.constant 0 : index
    %292 = vector.load %arg6[%c0_80, %c7_81, %c0_82, %c0_83] : memref<1x18x8x16xf32, #tpu.memory_space<vmem>>, vector<1x1x8x16xf32>
    %293 = vector.shape_cast %292 : vector<1x1x8x16xf32> to vector<8x16xf32>
    %294 = vector.shape_cast %291 : vector<8x16xf32> to vector<1x1x8x16xf32>
    tpu.vector_store %arg6[%c0_80, %c7_81, %c0_82, %c0_83], %294 {strides = array<i32>} : memref<1x18x8x16xf32, #tpu.memory_space<vmem>>, vector<1x1x8x16xf32>,
    %c56 = arith.constant 56 : index
    %295 = memref.load %arg4[%c56] : memref<96xf32, #tpu.memory_space<smem>>
    %296 = vector.broadcast %295 : f32 to vector<8x16xf32>
    %297 = arith.mulf %296, %186 : vector<8x16xf32>
    %c57 = arith.constant 57 : index
    %298 = memref.load %arg4[%c57] : memref<96xf32, #tpu.memory_space<smem>>
    %299 = vector.broadcast %298 : f32 to vector<8x16xf32>
    %300 = arith.mulf %299, %178 : vector<8x16xf32>
    %301 = arith.addf %297, %300 : vector<8x16xf32>
    %c58 = arith.constant 58 : index
    %302 = memref.load %arg4[%c58] : memref<96xf32, #tpu.memory_space<smem>>
    %303 = vector.broadcast %302 : f32 to vector<8x16xf32>
    %304 = arith.mulf %303, %182 : vector<8x16xf32>
    %305 = arith.addf %301, %304 : vector<8x16xf32>
    %c59 = arith.constant 59 : index
    %306 = memref.load %arg4[%c59] : memref<96xf32, #tpu.memory_space<smem>>
    %307 = vector.broadcast %306 : f32 to vector<8x16xf32>
    %308 = arith.mulf %307, %170 : vector<8x16xf32>
    %309 = arith.addf %305, %308 : vector<8x16xf32>
    %c0_84 = arith.constant 0 : index
    %c8_85 = arith.constant 8 : index
    %c0_86 = arith.constant 0 : index
    %c0_87 = arith.constant 0 : index
    %310 = vector.load %arg6[%c0_84, %c8_85, %c0_86, %c0_87] : memref<1x18x8x16xf32, #tpu.memory_space<vmem>>, vector<1x1x8x16xf32>
    %311 = vector.shape_cast %310 : vector<1x1x8x16xf32> to vector<8x16xf32>
    %312 = vector.shape_cast %309 : vector<8x16xf32> to vector<1x1x8x16xf32>
    tpu.vector_store %arg6[%c0_84, %c8_85, %c0_86, %c0_87], %312 {strides = array<i32>} : memref<1x18x8x16xf32, #tpu.memory_space<vmem>>, vector<1x1x8x16xf32>,
    %c60 = arith.constant 60 : index
    %313 = memref.load %arg4[%c60] : memref<96xf32, #tpu.memory_space<smem>>
    %314 = vector.broadcast %313 : f32 to vector<8x16xf32>
    %315 = arith.mulf %314, %186 : vector<8x16xf32>
    %c61 = arith.constant 61 : index
    %316 = memref.load %arg4[%c61] : memref<96xf32, #tpu.memory_space<smem>>
    %317 = vector.broadcast %316 : f32 to vector<8x16xf32>
    %318 = arith.mulf %317, %178 : vector<8x16xf32>
    %319 = arith.addf %315, %318 : vector<8x16xf32>
    %c62 = arith.constant 62 : index
    %320 = memref.load %arg4[%c62] : memref<96xf32, #tpu.memory_space<smem>>
    %321 = vector.broadcast %320 : f32 to vector<8x16xf32>
    %322 = arith.mulf %321, %182 : vector<8x16xf32>
    %323 = arith.addf %319, %322 : vector<8x16xf32>
    %c63 = arith.constant 63 : index
    %324 = memref.load %arg4[%c63] : memref<96xf32, #tpu.memory_space<smem>>
    %325 = vector.broadcast %324 : f32 to vector<8x16xf32>
    %326 = arith.mulf %325, %170 : vector<8x16xf32>
    %327 = arith.addf %323, %326 : vector<8x16xf32>
    %c0_88 = arith.constant 0 : index
    %c9_89 = arith.constant 9 : index
    %c0_90 = arith.constant 0 : index
    %c0_91 = arith.constant 0 : index
    %328 = vector.load %arg6[%c0_88, %c9_89, %c0_90, %c0_91] : memref<1x18x8x16xf32, #tpu.memory_space<vmem>>, vector<1x1x8x16xf32>
    %329 = vector.shape_cast %328 : vector<1x1x8x16xf32> to vector<8x16xf32>
    %330 = vector.shape_cast %327 : vector<8x16xf32> to vector<1x1x8x16xf32>
    tpu.vector_store %arg6[%c0_88, %c9_89, %c0_90, %c0_91], %330 {strides = array<i32>} : memref<1x18x8x16xf32, #tpu.memory_space<vmem>>, vector<1x1x8x16xf32>,
    %c0_92 = arith.constant 0 : index
    %c2_93 = arith.constant 2 : index
    %c0_94 = arith.constant 0 : index
    %c0_95 = arith.constant 0 : index
    %331 = vector.load %arg2[%c0_92, %c2_93, %c0_94, %c0_95] : memref<1x3x8x16xf32, #tpu.memory_space<vmem>>, vector<1x1x8x16xf32>
    %332 = vector.shape_cast %331 : vector<1x1x8x16xf32> to vector<8x16xf32>
    %c0_i32_96 = arith.constant 0 : i32
    %333 = arith.cmpi sgt, %arg1, %c0_i32_96 : i32
    %c0_97 = arith.constant 0 : index
    %c2_98 = arith.constant 2 : index
    %c7_99 = arith.constant 7 : index
    %c0_100 = arith.constant 0 : index
    %334 = vector.load %arg3[%c0_97, %c2_98, %c7_99, %c0_100] : memref<1x3x8x16xf32, #tpu.memory_space<vmem>>, vector<1x1x1x16xf32>
    %335 = vector.shape_cast %334 : vector<1x1x1x16xf32> to vector<1x16xf32>
    %336 = arith.select %333, %335, %6 : vector<1x16xf32>
    %337 = vector.shape_cast %336 : vector<1x16xf32> to vector<1x16xf32>
    %338 = vector.broadcast %337 : vector<1x16xf32> to vector<8x16xf32>
    %c1_i32_101 = arith.constant 1 : i32
    %339 = tpu.dynamic_rotate %332 by %c1_i32_101 dim 0 : vector<8x16xf32>, i32 -> vector<8x16xf32>
    %340 = arith.select %2, %338, %339 : vector<8x16xi1>, vector<8x16xf32>
    %c1_i32_102 = arith.constant 1 : i32
    %341 = tpu.dynamic_rotate %332 by %c1_i32_102 dim 1 : vector<8x16xf32>, i32 -> vector<8x16xf32>
    %c0_i32_103 = arith.constant 0 : i32
    %342 = arith.sitofp %c0_i32_103 : i32 to f32
    %343 = vector.broadcast %342 : f32 to vector<8x16xf32>
    %344 = arith.select %5, %343, %341 : vector<8x16xi1>, vector<8x16xf32>
    %c1_i32_104 = arith.constant 1 : i32
    %345 = tpu.dynamic_rotate %340 by %c1_i32_104 dim 1 : vector<8x16xf32>, i32 -> vector<8x16xf32>
    %c0_i32_105 = arith.constant 0 : i32
    %346 = arith.sitofp %c0_i32_105 : i32 to f32
    %347 = vector.broadcast %346 : f32 to vector<8x16xf32>
    %348 = arith.select %5, %347, %345 : vector<8x16xi1>, vector<8x16xf32>
    %c64 = arith.constant 64 : index
    %349 = memref.load %arg4[%c64] : memref<96xf32, #tpu.memory_space<smem>>
    %350 = vector.broadcast %349 : f32 to vector<8x16xf32>
    %351 = arith.mulf %350, %348 : vector<8x16xf32>
    %c65 = arith.constant 65 : index
    %352 = memref.load %arg4[%c65] : memref<96xf32, #tpu.memory_space<smem>>
    %353 = vector.broadcast %352 : f32 to vector<8x16xf32>
    %354 = arith.mulf %353, %340 : vector<8x16xf32>
    %355 = arith.addf %351, %354 : vector<8x16xf32>
    %c66 = arith.constant 66 : index
    %356 = memref.load %arg4[%c66] : memref<96xf32, #tpu.memory_space<smem>>
    %357 = vector.broadcast %356 : f32 to vector<8x16xf32>
    %358 = arith.mulf %357, %344 : vector<8x16xf32>
    %359 = arith.addf %355, %358 : vector<8x16xf32>
    %c67 = arith.constant 67 : index
    %360 = memref.load %arg4[%c67] : memref<96xf32, #tpu.memory_space<smem>>
    %361 = vector.broadcast %360 : f32 to vector<8x16xf32>
    %362 = arith.mulf %361, %332 : vector<8x16xf32>
    %363 = arith.addf %359, %362 : vector<8x16xf32>
    %c0_106 = arith.constant 0 : index
    %c10_107 = arith.constant 10 : index
    %c0_108 = arith.constant 0 : index
    %c0_109 = arith.constant 0 : index
    %364 = vector.load %arg6[%c0_106, %c10_107, %c0_108, %c0_109] : memref<1x18x8x16xf32, #tpu.memory_space<vmem>>, vector<1x1x8x16xf32>
    %365 = vector.shape_cast %364 : vector<1x1x8x16xf32> to vector<8x16xf32>
    %366 = vector.shape_cast %363 : vector<8x16xf32> to vector<1x1x8x16xf32>
    tpu.vector_store %arg6[%c0_106, %c10_107, %c0_108, %c0_109], %366 {strides = array<i32>} : memref<1x18x8x16xf32, #tpu.memory_space<vmem>>, vector<1x1x8x16xf32>,
    %c68 = arith.constant 68 : index
    %367 = memref.load %arg4[%c68] : memref<96xf32, #tpu.memory_space<smem>>
    %368 = vector.broadcast %367 : f32 to vector<8x16xf32>
    %369 = arith.mulf %368, %348 : vector<8x16xf32>
    %c69 = arith.constant 69 : index
    %370 = memref.load %arg4[%c69] : memref<96xf32, #tpu.memory_space<smem>>
    %371 = vector.broadcast %370 : f32 to vector<8x16xf32>
    %372 = arith.mulf %371, %340 : vector<8x16xf32>
    %373 = arith.addf %369, %372 : vector<8x16xf32>
    %c70 = arith.constant 70 : index
    %374 = memref.load %arg4[%c70] : memref<96xf32, #tpu.memory_space<smem>>
    %375 = vector.broadcast %374 : f32 to vector<8x16xf32>
    %376 = arith.mulf %375, %344 : vector<8x16xf32>
    %377 = arith.addf %373, %376 : vector<8x16xf32>
    %c71 = arith.constant 71 : index
    %378 = memref.load %arg4[%c71] : memref<96xf32, #tpu.memory_space<smem>>
    %379 = vector.broadcast %378 : f32 to vector<8x16xf32>
    %380 = arith.mulf %379, %332 : vector<8x16xf32>
    %381 = arith.addf %377, %380 : vector<8x16xf32>
    %c0_110 = arith.constant 0 : index
    %c11_111 = arith.constant 11 : index
    %c0_112 = arith.constant 0 : index
    %c0_113 = arith.constant 0 : index
    %382 = vector.load %arg6[%c0_110, %c11_111, %c0_112, %c0_113] : memref<1x18x8x16xf32, #tpu.memory_space<vmem>>, vector<1x1x8x16xf32>
    %383 = vector.shape_cast %382 : vector<1x1x8x16xf32> to vector<8x16xf32>
    %384 = vector.shape_cast %381 : vector<8x16xf32> to vector<1x1x8x16xf32>
    tpu.vector_store %arg6[%c0_110, %c11_111, %c0_112, %c0_113], %384 {strides = array<i32>} : memref<1x18x8x16xf32, #tpu.memory_space<vmem>>, vector<1x1x8x16xf32>,
    %c72 = arith.constant 72 : index
    %385 = memref.load %arg4[%c72] : memref<96xf32, #tpu.memory_space<smem>>
    %386 = vector.broadcast %385 : f32 to vector<8x16xf32>
    %387 = arith.mulf %386, %348 : vector<8x16xf32>
    %c73 = arith.constant 73 : index
    %388 = memref.load %arg4[%c73] : memref<96xf32, #tpu.memory_space<smem>>
    %389 = vector.broadcast %388 : f32 to vector<8x16xf32>
    %390 = arith.mulf %389, %340 : vector<8x16xf32>
    %391 = arith.addf %387, %390 : vector<8x16xf32>
    %c74 = arith.constant 74 : index
    %392 = memref.load %arg4[%c74] : memref<96xf32, #tpu.memory_space<smem>>
    %393 = vector.broadcast %392 : f32 to vector<8x16xf32>
    %394 = arith.mulf %393, %344 : vector<8x16xf32>
    %395 = arith.addf %391, %394 : vector<8x16xf32>
    %c75 = arith.constant 75 : index
    %396 = memref.load %arg4[%c75] : memref<96xf32, #tpu.memory_space<smem>>
    %397 = vector.broadcast %396 : f32 to vector<8x16xf32>
    %398 = arith.mulf %397, %332 : vector<8x16xf32>
    %399 = arith.addf %395, %398 : vector<8x16xf32>
    %c0_114 = arith.constant 0 : index
    %c12_115 = arith.constant 12 : index
    %c0_116 = arith.constant 0 : index
    %c0_117 = arith.constant 0 : index
    %400 = vector.load %arg6[%c0_114, %c12_115, %c0_116, %c0_117] : memref<1x18x8x16xf32, #tpu.memory_space<vmem>>, vector<1x1x8x16xf32>
    %401 = vector.shape_cast %400 : vector<1x1x8x16xf32> to vector<8x16xf32>
    %402 = vector.shape_cast %399 : vector<8x16xf32> to vector<1x1x8x16xf32>
    tpu.vector_store %arg6[%c0_114, %c12_115, %c0_116, %c0_117], %402 {strides = array<i32>} : memref<1x18x8x16xf32, #tpu.memory_space<vmem>>, vector<1x1x8x16xf32>,
    %c76 = arith.constant 76 : index
    %403 = memref.load %arg4[%c76] : memref<96xf32, #tpu.memory_space<smem>>
    %404 = vector.broadcast %403 : f32 to vector<8x16xf32>
    %405 = arith.mulf %404, %348 : vector<8x16xf32>
    %c77 = arith.constant 77 : index
    %406 = memref.load %arg4[%c77] : memref<96xf32, #tpu.memory_space<smem>>
    %407 = vector.broadcast %406 : f32 to vector<8x16xf32>
    %408 = arith.mulf %407, %340 : vector<8x16xf32>
    %409 = arith.addf %405, %408 : vector<8x16xf32>
    %c78 = arith.constant 78 : index
    %410 = memref.load %arg4[%c78] : memref<96xf32, #tpu.memory_space<smem>>
    %411 = vector.broadcast %410 : f32 to vector<8x16xf32>
    %412 = arith.mulf %411, %344 : vector<8x16xf32>
    %413 = arith.addf %409, %412 : vector<8x16xf32>
    %c79 = arith.constant 79 : index
    %414 = memref.load %arg4[%c79] : memref<96xf32, #tpu.memory_space<smem>>
    %415 = vector.broadcast %414 : f32 to vector<8x16xf32>
    %416 = arith.mulf %415, %332 : vector<8x16xf32>
    %417 = arith.addf %413, %416 : vector<8x16xf32>
    %c0_118 = arith.constant 0 : index
    %c13_119 = arith.constant 13 : index
    %c0_120 = arith.constant 0 : index
    %c0_121 = arith.constant 0 : index
    %418 = vector.load %arg6[%c0_118, %c13_119, %c0_120, %c0_121] : memref<1x18x8x16xf32, #tpu.memory_space<vmem>>, vector<1x1x8x16xf32>
    %419 = vector.shape_cast %418 : vector<1x1x8x16xf32> to vector<8x16xf32>
    %420 = vector.shape_cast %417 : vector<8x16xf32> to vector<1x1x8x16xf32>
    tpu.vector_store %arg6[%c0_118, %c13_119, %c0_120, %c0_121], %420 {strides = array<i32>} : memref<1x18x8x16xf32, #tpu.memory_space<vmem>>, vector<1x1x8x16xf32>,
    %c80 = arith.constant 80 : index
    %421 = memref.load %arg4[%c80] : memref<96xf32, #tpu.memory_space<smem>>
    %422 = vector.broadcast %421 : f32 to vector<8x16xf32>
    %423 = arith.mulf %422, %348 : vector<8x16xf32>
    %c81 = arith.constant 81 : index
    %424 = memref.load %arg4[%c81] : memref<96xf32, #tpu.memory_space<smem>>
    %425 = vector.broadcast %424 : f32 to vector<8x16xf32>
    %426 = arith.mulf %425, %340 : vector<8x16xf32>
    %427 = arith.addf %423, %426 : vector<8x16xf32>
    %c82 = arith.constant 82 : index
    %428 = memref.load %arg4[%c82] : memref<96xf32, #tpu.memory_space<smem>>
    %429 = vector.broadcast %428 : f32 to vector<8x16xf32>
    %430 = arith.mulf %429, %344 : vector<8x16xf32>
    %431 = arith.addf %427, %430 : vector<8x16xf32>
    %c83 = arith.constant 83 : index
    %432 = memref.load %arg4[%c83] : memref<96xf32, #tpu.memory_space<smem>>
    %433 = vector.broadcast %432 : f32 to vector<8x16xf32>
    %434 = arith.mulf %433, %332 : vector<8x16xf32>
    %435 = arith.addf %431, %434 : vector<8x16xf32>
    %c0_122 = arith.constant 0 : index
    %c14_123 = arith.constant 14 : index
    %c0_124 = arith.constant 0 : index
    %c0_125 = arith.constant 0 : index
    %436 = vector.load %arg6[%c0_122, %c14_123, %c0_124, %c0_125] : memref<1x18x8x16xf32, #tpu.memory_space<vmem>>, vector<1x1x8x16xf32>
    %437 = vector.shape_cast %436 : vector<1x1x8x16xf32> to vector<8x16xf32>
    %438 = vector.shape_cast %435 : vector<8x16xf32> to vector<1x1x8x16xf32>
    tpu.vector_store %arg6[%c0_122, %c14_123, %c0_124, %c0_125], %438 {strides = array<i32>} : memref<1x18x8x16xf32, #tpu.memory_space<vmem>>, vector<1x1x8x16xf32>,
    %c84 = arith.constant 84 : index
    %439 = memref.load %arg4[%c84] : memref<96xf32, #tpu.memory_space<smem>>
    %440 = vector.broadcast %439 : f32 to vector<8x16xf32>
    %441 = arith.mulf %440, %348 : vector<8x16xf32>
    %c85 = arith.constant 85 : index
    %442 = memref.load %arg4[%c85] : memref<96xf32, #tpu.memory_space<smem>>
    %443 = vector.broadcast %442 : f32 to vector<8x16xf32>
    %444 = arith.mulf %443, %340 : vector<8x16xf32>
    %445 = arith.addf %441, %444 : vector<8x16xf32>
    %c86 = arith.constant 86 : index
    %446 = memref.load %arg4[%c86] : memref<96xf32, #tpu.memory_space<smem>>
    %447 = vector.broadcast %446 : f32 to vector<8x16xf32>
    %448 = arith.mulf %447, %344 : vector<8x16xf32>
    %449 = arith.addf %445, %448 : vector<8x16xf32>
    %c87 = arith.constant 87 : index
    %450 = memref.load %arg4[%c87] : memref<96xf32, #tpu.memory_space<smem>>
    %451 = vector.broadcast %450 : f32 to vector<8x16xf32>
    %452 = arith.mulf %451, %332 : vector<8x16xf32>
    %453 = arith.addf %449, %452 : vector<8x16xf32>
    %c0_126 = arith.constant 0 : index
    %c15_127 = arith.constant 15 : index
    %c0_128 = arith.constant 0 : index
    %c0_129 = arith.constant 0 : index
    %454 = vector.load %arg6[%c0_126, %c15_127, %c0_128, %c0_129] : memref<1x18x8x16xf32, #tpu.memory_space<vmem>>, vector<1x1x8x16xf32>
    %455 = vector.shape_cast %454 : vector<1x1x8x16xf32> to vector<8x16xf32>
    %456 = vector.shape_cast %453 : vector<8x16xf32> to vector<1x1x8x16xf32>
    tpu.vector_store %arg6[%c0_126, %c15_127, %c0_128, %c0_129], %456 {strides = array<i32>} : memref<1x18x8x16xf32, #tpu.memory_space<vmem>>, vector<1x1x8x16xf32>,
    %c88 = arith.constant 88 : index
    %457 = memref.load %arg4[%c88] : memref<96xf32, #tpu.memory_space<smem>>
    %458 = vector.broadcast %457 : f32 to vector<8x16xf32>
    %459 = arith.mulf %458, %348 : vector<8x16xf32>
    %c89 = arith.constant 89 : index
    %460 = memref.load %arg4[%c89] : memref<96xf32, #tpu.memory_space<smem>>
    %461 = vector.broadcast %460 : f32 to vector<8x16xf32>
    %462 = arith.mulf %461, %340 : vector<8x16xf32>
    %463 = arith.addf %459, %462 : vector<8x16xf32>
    %c90 = arith.constant 90 : index
    %464 = memref.load %arg4[%c90] : memref<96xf32, #tpu.memory_space<smem>>
    %465 = vector.broadcast %464 : f32 to vector<8x16xf32>
    %466 = arith.mulf %465, %344 : vector<8x16xf32>
    %467 = arith.addf %463, %466 : vector<8x16xf32>
    %c91 = arith.constant 91 : index
    %468 = memref.load %arg4[%c91] : memref<96xf32, #tpu.memory_space<smem>>
    %469 = vector.broadcast %468 : f32 to vector<8x16xf32>
    %470 = arith.mulf %469, %332 : vector<8x16xf32>
    %471 = arith.addf %467, %470 : vector<8x16xf32>
    %c0_130 = arith.constant 0 : index
    %c16_131 = arith.constant 16 : index
    %c0_132 = arith.constant 0 : index
    %c0_133 = arith.constant 0 : index
    %472 = vector.load %arg6[%c0_130, %c16_131, %c0_132, %c0_133] : memref<1x18x8x16xf32, #tpu.memory_space<vmem>>, vector<1x1x8x16xf32>
    %473 = vector.shape_cast %472 : vector<1x1x8x16xf32> to vector<8x16xf32>
    %474 = vector.shape_cast %471 : vector<8x16xf32> to vector<1x1x8x16xf32>
    tpu.vector_store %arg6[%c0_130, %c16_131, %c0_132, %c0_133], %474 {strides = array<i32>} : memref<1x18x8x16xf32, #tpu.memory_space<vmem>>, vector<1x1x8x16xf32>,
    %c92 = arith.constant 92 : index
    %475 = memref.load %arg4[%c92] : memref<96xf32, #tpu.memory_space<smem>>
    %476 = vector.broadcast %475 : f32 to vector<8x16xf32>
    %477 = arith.mulf %476, %348 : vector<8x16xf32>
    %c93 = arith.constant 93 : index
    %478 = memref.load %arg4[%c93] : memref<96xf32, #tpu.memory_space<smem>>
    %479 = vector.broadcast %478 : f32 to vector<8x16xf32>
    %480 = arith.mulf %479, %340 : vector<8x16xf32>
    %481 = arith.addf %477, %480 : vector<8x16xf32>
    %c94 = arith.constant 94 : index
    %482 = memref.load %arg4[%c94] : memref<96xf32, #tpu.memory_space<smem>>
    %483 = vector.broadcast %482 : f32 to vector<8x16xf32>
    %484 = arith.mulf %483, %344 : vector<8x16xf32>
    %485 = arith.addf %481, %484 : vector<8x16xf32>
    %c95 = arith.constant 95 : index
    %486 = memref.load %arg4[%c95] : memref<96xf32, #tpu.memory_space<smem>>
    %487 = vector.broadcast %486 : f32 to vector<8x16xf32>
    %488 = arith.mulf %487, %332 : vector<8x16xf32>
    %489 = arith.addf %485, %488 : vector<8x16xf32>
    %c0_134 = arith.constant 0 : index
    %c17_135 = arith.constant 17 : index
    %c0_136 = arith.constant 0 : index
    %c0_137 = arith.constant 0 : index
    %490 = vector.load %arg6[%c0_134, %c17_135, %c0_136, %c0_137] : memref<1x18x8x16xf32, #tpu.memory_space<vmem>>, vector<1x1x8x16xf32>
    %491 = vector.shape_cast %490 : vector<1x1x8x16xf32> to vector<8x16xf32>
    %492 = vector.shape_cast %489 : vector<8x16xf32> to vector<1x1x8x16xf32>
    tpu.vector_store %arg6[%c0_134, %c17_135, %c0_136, %c0_137], %492 {strides = array<i32>} : memref<1x18x8x16xf32, #tpu.memory_space<vmem>>, vector<1x1x8x16xf32>,
    return
  }
  func.func @transform_0(%arg0: i32, %arg1: i32) -> (i32, i32, i32, i32) {
    %c0_i32 = arith.constant 0 : i32
    %c0_i32_0 = arith.constant 0 : i32
    %c0_i32_1 = arith.constant 0 : i32
    return %arg0, %c0_i32, %arg1, %c0_i32_0 : i32, i32, i32, i32
  }
  func.func @transform_1(%arg0: i32, %arg1: i32) -> (i32, i32, i32, i32) {
    %c1_i32 = arith.constant 1 : i32
    %0 = arith.subi %arg1, %c1_i32 : i32
    %c0_i32 = arith.constant 0 : i32
    %1 = arith.maxsi %0, %c0_i32 : i32
    %c0_i32_0 = arith.constant 0 : i32
    %c0_i32_1 = arith.constant 0 : i32
    %c0_i32_2 = arith.constant 0 : i32
    return %arg0, %c0_i32_0, %1, %c0_i32_1 : i32, i32, i32, i32
  }
  func.func @transform_2(%arg0: i32, %arg1: i32) -> i32 {
    %c0_i32 = arith.constant 0 : i32
    %c0_i32_0 = arith.constant 0 : i32
    return %c0_i32 : i32
  }
  func.func @transform_3(%arg0: i32, %arg1: i32) -> (i32, i32, i32, i32) {
    %c0_i32 = arith.constant 0 : i32
    %c0_i32_0 = arith.constant 0 : i32
    %c0_i32_1 = arith.constant 0 : i32
    return %arg0, %c0_i32, %arg1, %c0_i32_0 : i32, i32, i32, i32
  }
  func.func @transform_4(%arg0: i32, %arg1: i32) -> (i32, i32, i32, i32) {
    %c0_i32 = arith.constant 0 : i32
    %c0_i32_0 = arith.constant 0 : i32
    %c0_i32_1 = arith.constant 0 : i32
    return %arg0, %c0_i32, %arg1, %c0_i32_0 : i32, i32, i32, i32
  }
}

</mosaic_0001>

<bundles_post_ra>
// kernel: learnable_haar_split_merge_forward.1
= control target key start
LH: loop header
LB: loop body
LE: loop exit
PB: predicated region body
PF: predicated region fallthrough
CT: control target
= control target key end

     0   :  { %s2430_s0 = inlined_call_operand.vmem [shape: f32[2,3,16,16], index: 0, kind: input, shape index: {}, may-alias: {0,1}]   ;;  %s2431_s1 = inlined_call_operand.vmem [shape: f32[2,3,16,16], index: 1, kind: input, shape index: {}, may-alias: {0,1}]   ;;  %s2432_s2 = inlined_call_operand.vmem [shape: f32[96], index: 2, kind: input, shape index: {}]   ;;  %s2433_s3 = inlined_call_operand.hbm [shape: f32[2,6,16,16], index: 3, kind: output, shape index: {0}]   ;;  %s2434_s4 = inlined_call_operand.vmem [shape: f32[2,18,16,16], index: 4, kind: output, shape index: {1}]  }
   0x1   :  { %2475 = sst [smem:[#allocation53_spill]] %s2430_s0 }
   0x2   :  { %2476 = sst [smem:[#allocation54_spill]] %s2431_s1 }
   0x3   :  { %2477 = sst [smem:[#allocation55_spill]] %s2432_s2 }
   0x4   :  { %2478 = sst [smem:[#allocation56_spill]] %s2433_s3 }
   0x5   :  { %2479 = sst [smem:[#allocation57_spill]] %s2434_s4 }
   0x6   :  { %10 = vsyncpa [#allocation6], 0 }
   0x7   :  { %11 = vsyncpa [#allocation5], 0 }
   0x8   :  { %13 = vsyncpa [#allocation5 + $0x1], 0  ;;  %s1552_s15 = smov 0   ;;  %s1554_s16 = smov 0  }
   0x9   :  { %s1556_s17 = smov 0   ;;  %s1558_s18 = smov 0  }
   0xa   :  { %s1560_s19 = smov 0   ;;  %s1562_s20 = smov 0  }
   0xb   :  { %s1564_s21 = smov 0   ;;  %s1566_s22 = smov 0  }
   0xc   :  { %s1568_s23 = smov 0   ;;  %s1570_s24 = smov 0  }
   0xd LB: > { %2480 = sst [smem:[#allocation11_spill]] %s1483_s15  ;;  %s1139_s25 = sadd.s32 4294967295, %s1519_s24   ;;  %s1519_s24 = sphi %s1570_s24, %s19_s24   ;;  %s1515_s23 = sphi %s1568_s23, %s2614_s23   ;;  %s1511_s22 = sphi %s1566_s22, %s2613_s22   ;;  %s1507_s21 = sphi %s1564_s21, %s2612_s21   ;;  %s1503_s20 = sphi %s1562_s20, %s2611_s20   ;;  %s1499_s19 = sphi %s1560_s19, %s2610_s19   ;;  %s1495_s18 = sphi %s1558_s18, %s2609_s18   ;;  %s1491_s17 = sphi %s1556_s17, %s2608_s17   ;;  %s1487_s16 = sphi %s1554_s16, %s2607_s16   ;;  %s1483_s15 = sphi %s1552_s15, %s2606_s15  }
   0xe   : > { %2481 = sst [smem:[#allocation12_spill]] %s1491_s17  ;;  %s1140_s26 = sadd.s32 4294967294, %s1519_s24  }
   0xf   : > { %2482 = sst [smem:[#allocation13_spill]] %s1495_s18  ;;  %s28_s27 = sadd.s32 1, %s1511_s22 }
  0x10   : > { %2483 = sst [smem:[#allocation14_spill]] %s1499_s19  ;;  %s31_s28 = sadd.s32 1, %s1515_s23 }
  0x11   : > { %2484 = sst [smem:[#allocation15_spill]] %s1503_s20  ;;  %p29_p0 = scmp.ge.s32.totalorder %s28_s27, 2 }
  0x12   : > { %2485 = sst [smem:[#allocation16_spill]] %s1507_s21  ;;  %s40_s29 = sadd.s32 1, %s1499_s19 }
  0x13   : > { %2486 = sst [smem:[#allocation17_spill]] %s1511_s22  ;;  %p47_p1 = scmp.ne.s32.totalorder %s1499_s19, %s1495_s18 }
  0x14   : > { %2487 = sst [smem:[#allocation18_spill]] %s1515_s23  ;;  %p48_p2 = scmp.eq.s32.totalorder %s1519_s24, 0 }
  0x15   : > { %2488 = sst [smem:[#allocation19_spill]] %s1519_s24  ;;  %s2616_s27 = smov (%p29_p0, %s28_s27), 0 }
  0x16   : > { %2489 = sst [smem:[#allocation20_spill]] %s2616_s27  ;;  %s2618_s28 = smov (!%p29_p0, %s31_s28), %s1515_s23 }
  0x17   : > { %s36_s30 = ssub.s32 %s1511_s22, %s2616_s27  ;;  %p1620_p3 = por %p48_p2, %p47_p1 }
  0x18   : > { %p33_p4 = scmp.ge.s32.totalorder %s2618_s28, 2  ;;  %s74_s8 = sadd.s32 1, %s1491_s17 }
  0x19   : > { %p81_p6 = scmp.ne.s32.totalorder %s1491_s17, %s1487_s16  ;;  %p134_p8 = scmp.eq.s32.totalorder %s1139_s25, 3 }
  0x1a   : > { %s2620_s28 = smov (%p33_p4, %s2618_s28), 0  ;;  %p139_p10 = scmp.ne.s32.totalorder %s1495_s18, %s1483_s15 }
  0x1b   : > { %2491 = sst [smem:[#allocation21_spill]] %s2620_s28  ;;  %s35_s6 = ssub.s32 %s1515_s23, %s2620_s28 }
  0x1c   : > { %s37_s7 = sor.u32 %s36_s30, %s35_s6  ;;  %p1636_p7 = por %p81_p6, %p48_p2 }
  0x1d   : > { %p38_p5 = scmp.eq.s32.totalorder %s37_s7, 0  ;;  %p72_p9 = scmp.eq.s32.totalorder %s35_s6, 0 }
  0x1e   : > { %p1647_p11 = por %p134_p8, %p47_p1  ;;  %p140_p12 = scmp.eq.s32.totalorder %s1140_s26, 3 }
  0x1f   : > { %s1632_s9 = scalar_select %p38_p5, %s1499_s19, %s40_s29  }
  0x20   : > { %s2494_s11 = scalar_select %p1647_p11, 1, 0 }
  0x21   : > { %2492 = sst [smem:[#allocation22_spill]] %s1632_s9  ;;  %p1654_p13 = por %p140_p12, %p139_p10 }
  0x22   : > { %2495 = sst [smem:[#allocation23_spill]] %s2494_s11  ;;  %p1143_p0 = scmp.ge.s32.totalorder %s1519_s24, 1 }
  0x23   : > { %s1652_s12 = scalar_select %p72_p9, %s1491_s17, %s74_s8  }
  0x24   : > { %s2497_s13 = scalar_select %p1654_p13, 1, 0 }
  0x25   : > { %2496 = sst [smem:[#allocation24_spill]] %s1652_s12  ;;  %p175_p2 = scmp.lt.s32.totalorder %s1519_s24, 5 }
  0x26   : > { %2498 = sst [smem:[#allocation25_spill]] %s2497_s13  ;;  %p1662_p4 = scmp.eq.s32.totalorder %s1139_s25, 0 }
  0x27   : > { %p1666_p5 = pnand %p1143_p0, %p175_p2  ;;  %s2501_s2 = sld [smem:[#allocation55_spill]] }
  0x28   : > { %s1521_s7 = smov [#allocation4]   ;;  %p1145_p8 = scmp.ge.s32.totalorder %s1519_s24, 4 }
  0x29   : > { %p1292_p1 = pneg %p1666_p5 }
  0x2a   : > { %194 = sbr.rel (%p1145_p8) target bundleno = 71 (0x47), region = 20 }
  0x2b   : > { %p1293_p6 = pnand %p1662_p4, %p1292_p1 }
  0x2d   : > { %s187_s6 = sshll.u32 %s2501_s2, 4  ;;  %s188_s6 = int_to_ptr.vmem [resolvable:$true] %s187_s6 }
  0x2e   : > { %1295 = dma.vmem_to_smem (!%p1293_p6), %s188_s6, 16, %s1521_s7, [#allocation6]  }
  0x2f   : > { %197 = sbr.rel (!%p1620_p3) target bundleno = 59 (0x3b), region = 24  ;;  %s199_s25 = sand.u32 (%p1620_p3), 1, %s1499_s19  }
  0x30   : > { %s1277_s8 = smul.u32 (%p1620_p3), 6, %s1515_s23  ;;  %s2502_s0 = sld [smem:[#allocation53_spill]] (%p1620_p3) }
  0x31   : > { %s1276_s30 = smul.u32 (%p1620_p3), 24, %s199_s25 }
  0x32   : > { %s203_s26 = sadd.s32 (%p1620_p3), %s1511_s22, %s1277_s8 }
  0x33   : > { %s1146_s2 = sshll.u32 (%p1620_p3), %s203_s26, 3  ;;  %s201_s6 = scalar_lea.vmem (%p1620_p3), [#allocation2], %s1276_s30 }
  0x36   : > { %s205_s9 = scalar_lea.vmem %s2502_s0, %s1146_s2 }
  0x37   : > { %v238_v0 = vld [vmem:[%s205_s9] sm:$0xff]  ;;  %v240_v1 = vld [vmem:[%s205_s9 + $0x10] sm:$0xff] }
  0x38   : > { %v242_v2 = vld [vmem:[%s205_s9 + $0x20] sm:$0xff]  ;;  %239 = vst [vmem:[%s201_s6] sm:$0xff] %v238_v0 }
  0x39   : > { %241 = vst [vmem:[%s201_s6 + $0x8] sm:$0xff] %v240_v1 }
  0x3a   : > { %243 = vst [vmem:[%s201_s6 + $0x10] sm:$0xff] %v242_v2 }
  0x3b PF: > { %249 = sbr.rel (!%p1636_p7) target bundleno = 71 (0x47), region = 62  ;;  %s251_s5 = sand.u32 (%p1636_p7), 1, %s1491_s17  }
  0x3c   : > { %s1278_s7 = smul.u32 (%p1636_p7), 24, %s251_s5  ;;  %s2503_s1 = sld [smem:[#allocation54_spill]] (%p1636_p7) }
  0x3d   : > { %s1480_s25 = smul.u32 (%p1636_p7), 48, %s1515_s23 }
  0x3e   : > { %s253_s27 = scalar_lea.vmem (%p1636_p7), [#allocation3], %s1278_s7 }
  0x42   : > { %s260_s2 = scalar_lea.vmem %s2503_s1, %s1480_s25 }
  0x43   : > { %v293_v3 = vld [vmem:[%s260_s2] sm:$0xff]  ;;  %v295_v4 = vld [vmem:[%s260_s2 + $0x10] sm:$0xff] }
  0x44   : > { %v297_v5 = vld [vmem:[%s260_s2 + $0x20] sm:$0xff]  ;;  %294 = vst [vmem:[%s253_s27] sm:$0xff] %v293_v3 }
  0x45   : > { %296 = vst [vmem:[%s253_s27 + $0x8] sm:$0xff] %v295_v4 }
  0x46   : > { %298 = vst [vmem:[%s253_s27 + $0x10] sm:$0xff] %v297_v5 }
  0x47 PF: > { %307 = sbr.rel (%p1666_p5) target bundleno = 508 (0x1fc), region = 100 }
  0x4c   : > { %s1696_s28 = sand.u32 1, %s1495_s18   ;;  %s317_s9 = sand.u32 1, %s1487_s16  }
  0x4d   : > { %2504 = sst [smem:[#allocation26_spill]] %s1696_s28  ;;  %s1280_s10 = smul.u32 24, %s1696_s28 }
  0x4e   : > { %s1281_s30 = smul.u32 24, %s317_s9 }
  0x4f   : > { %s312_s6 = scalar_lea.vmem [#allocation2], %s1280_s10 }
  0x50   : > { %s319_s5 = scalar_lea.vmem [#allocation3], %s1281_s30 }
  0x51   : > { %1473 = dma.done.wait (%p1662_p4), [#allocation6], 16  }
  0x52   : > { %1475 = vsyncadd (%p1662_p4), [#allocation6], 4294967280 }
  0x53   : > { %328 = sfence }
  0x54   : > { %v359_v6 = vlaneseq  ;;  %p366_p3 = scmp.gt.s32.totalorder %s1503_s20, 0  ;;  %v1705_v7 = vld [vmem:[%s312_s6 + $0x8] sm:$0xff]  ;;  %v1708_v9 = vld [vmem:[%s312_s6 + $0x10] sm:$0xff]  ;;  %v1710_v10 = vld [vmem:[%s312_s6] sm:$0xff]  ;;  %s1522_s16 = smov 16   ;;  %vm375_vm2 = vcmask 1047680  }
  0x55   : > { %541 = vrot.lane.b32.xlu2 %v1705_v7, %s1522_s16  ;;  %v1231_v11 = vld [vmem:[%s319_s5 + $0x17] sm:$0x1]  ;;  %v367_v12 = vld [vmem:[%s319_s5 + $0x7] sm:$0x1]  ;;  %v705_v14 = vrot.slane %v1708_v9, 7  ;;  %v373_v15 = vrot.slane %v1710_v10, 7 }
  0x56   : > { %v360_v8 = vshrl.u32 %v359_v6, 7  ;;  %s368_s29 = scalar_select %p366_p3, 1, 0  ;;  %v1189_v16 = vld [vmem:[%s319_s5 + $0xf] sm:$0x1]  ;;  %v539_v25 = vrot.slane %v1705_v7, 7 }
  0x57   : > { %s1523_s14 = smov 113   ;;  %s1763_s7 = sld [smem:[#allocation4 + $0x40]]  ;;  %v1840_v51 = vand.u32 127, %v359_v6  ;;  %vm413_vm4 = vcmask 130048  }
  0x58   : > { %v369_v13 = vstv %s368_s29  ;;  %vm361_vm1 = vcmp.eq.s32.totalorder %v360_v8, 0  ;;  %s1765_s25 = sld [smem:[#allocation4 + $0x41]] }
  0x59   : > { %vm370_vm0 = vcmp.eq.s32.totalorder %v369_v13, 1  ;;  %s1767_s8 = sld [smem:[#allocation4 + $0x44]]  ;;  %vm364_vm3 = vcmp.eq.s32.totalorder %v1840_v51, 0 }
  0x5a   : > { %v703_v17 = vsel %vm370_vm0, %v1231_v11, 0.0  ;;  %v371_v18 = vsel %vm370_vm0, %v367_v12, 0.0  ;;  %v537_v21 = vsel %vm370_vm0, %v1189_v16, 0.0  ;;  %s1769_s26 = sld [smem:[#allocation4 + $0x45]] }
  0x5b   : > { %v704_v19 = vperm.slane %v703_v17, 0  ;;  %v372_v20 = vperm.slane %v371_v18, 0  ;;  %v538_v24 = vperm.slane %v537_v21, 0  ;;  %s1771_s2 = sld [smem:[#allocation4 + $0x48]] }
  0x5c   : > { %s1773_s27 = sld [smem:[#allocation4 + $0x49]] }
  0x5d   : > { %v1716_v22 = vsel %vm361_vm1, %v704_v19, %v705_v14  ;;  %v1718_v23 = vsel %vm361_vm1, %v372_v20, %v373_v15  ;;  %707 = vrot.lane.b32.xlu2 %v1708_v9, %s1522_s16  ;;  %v1727_v26 = vsel %vm361_vm1, %v538_v24, %v539_v25  ;;  %s1775_s9 = sld [smem:[#allocation4 + $0x4c]]  ;;  %v730_v52 = vstv %s1763_s7 }
  0x5e   : > { %718 = vrot.lane.b32.xlu1 %v1716_v22, %s1522_s16  ;;  %387 = vrot.lane.b32.xlu0 %v1718_v23, %s1522_s16  ;;  %s1777_s10 = sld [smem:[#allocation4 + $0x4d]]  ;;  %v733_v53 = vstv %s1765_s25 }
  0x5f   : > { %s1779_s30 = sld [smem:[#allocation4 + $0x50]]  ;;  %v747_v54 = vstv %s1767_s8  ;;  %v734_v4 = vmul.f32 %v733_v53, %v1716_v22 }
  0x60   : > { %s1781_s6 = sld [smem:[#allocation4 + $0x51]]  ;;  %v750_v55 = vstv %s1769_s26 }
  0x61   : > { %s1783_s5 = sld [smem:[#allocation4 + $0x54]]  ;;  %v764_v56 = vstv %s1771_s2  ;;  %v751_v5 = vmul.f32 %v750_v55, %v1716_v22 }
  0x62   : > { %s1785_s29 = sld [smem:[#allocation4 + $0x55]]  ;;  %v767_v57 = vstv %s1773_s27 }
  0x63   : > { %s1791_s0 = sld [smem:[#allocation4 + $0x5c]]  ;;  %v781_v58 = vstv %s1775_s9  ;;  %v768_v11 = vmul.f32 %v767_v57, %v1716_v22 }
  0x64   : > { %s1793_s1 = sld [smem:[#allocation4 + $0x5d]]  ;;  %v784_v59 = vstv %s1777_s10 }
  0x65   : > { %s1795_s23 = sld [smem:[#allocation4 + $0x42]]  ;;  %v798_v60 = vstv %s1779_s30  ;;  %v785_v12 = vmul.f32 %v784_v59, %v1716_v22 }
  0x66   : > { %376 = vrot.lane.b32.xlu1 %v1710_v10, %s1522_s16  ;;  %552 = vrot.lane.b32.xlu0 %v1727_v26, %s1522_s16  ;;  %s1797_s22 = sld [smem:[#allocation4 + $0x43]]  ;;  %v801_v61 = vstv %s1781_s6 }
  0x67   : > { %s1799_s19 = sld [smem:[#allocation4 + $0x46]]  ;;  %v815_v62 = vstv %s1783_s5  ;;  %v802_v16 = vmul.f32 %v801_v61, %v1716_v22 }
  0x68   : > { %s1801_s12 = sld [smem:[#allocation4 + $0x47]]  ;;  %v818_v63 = vstv %s1785_s29 }
  0x69   : > { %s1803_s17 = sld [smem:[#allocation4 + $0x4a]]  ;;  %v849_v2 = vstv %s1791_s0  ;;  %v819_v17 = vmul.f32 %v818_v63, %v1716_v22 }
  0x6a   : > { %s1805_s18 = sld [smem:[#allocation4 + $0x4b]]  ;;  %v852_v3 = vstv %s1793_s1 }
  0x6b   : > { %s1807_s13 = sld [smem:[#allocation4 + $0x4e]]  ;;  %v853_v19 = vmul.f32 %v852_v3, %v1716_v22  ;;  %v737_v20 = vstv %s1795_s23 }
  0x6c   : > { %s1809_s15 = sld [smem:[#allocation4 + $0x4f]]  ;;  %v741_v6 = vstv %s1797_s22 }
  0x6d   : > { %s1811_s24 = sld [smem:[#allocation4 + $0x52]]  ;;  %v1894_v21 = vmul.f32 %v1708_v9, %v741_v6  ;;  %v754_v24 = vstv %s1799_s19 }
  0x6e   : > { %s1813_s4 = sld [smem:[#allocation4 + $0x53]]  ;;  %v758_v13 = vstv %s1801_s12 }
  0x6f   : > { %s1815_s11 = sld [smem:[#allocation4 + $0x56]]  ;;  %v1900_v25 = vmul.f32 %v1708_v9, %v758_v13 }
  0x70   : > { %s1817_s3 = sld [smem:[#allocation4 + $0x57]]  ;;  %v775_v14 = vstv %s1805_s18 }
  0x71   : > { %2505 = sst [smem:[#allocation27_spill]] %s1807_s13 }
  0x72   : > { %2506 = sst [smem:[#allocation28_spill]] %s1809_s15 }
  0x73   : > { %s1819_s20 = sld [smem:[#allocation4 + $0x5a]] }
  0x74   : > { %2507 = sst [smem:[#allocation29_spill]] %s1813_s4 }
  0x75   : > { %2508 = sst [smem:[#allocation30_spill]] %s1815_s11 }
  0x76   : > { %2509 = sst [smem:[#allocation31_spill]] %s1817_s3 }
  0x77   : > { %s1821_s21 = sld [smem:[#allocation4 + $0x5b]] }
  0x78   : > { %s1823_s28 = sld [smem:[#allocation4 + $0x5e]] }
  0x79   : > { %2510 = sst [smem:[#allocation32_spill]] %s1819_s20 }
  0x7a   : > { %s1825_s13 = sld [smem:[#allocation4 + $0x5f]] }
  0x7b   : > { %s1827_s15 = sld [smem:[#allocation4]] }
  0x7c   : > { %s1829_s4 = sld [smem:[#allocation4 + $0x1]] }
  0x7d   : > { %2511 = sst [smem:[#allocation33_spill]] %s1821_s21 }
  0x7e   : > { %s1831_s11 = sld [smem:[#allocation4 + $0x4]] }
  0x7f   : > { %s1833_s3 = sld [smem:[#allocation4 + $0x5]] }
  0x80   : > { %2512 = sst [smem:[#allocation34_spill]] %s1825_s13 }
  0x81   : > { %2513 = sst [smem:[#allocation35_spill]] %s1827_s15 }
  0x82   : > { %2514 = sst [smem:[#allocation36_spill]] %s1829_s4 }
  0x83   : > { %s1835_s20 = sld [smem:[#allocation4 + $0x8]] }
  0x84   : > { %s1837_s21 = sld [smem:[#allocation4 + $0x9]] }
  0x85   : > { %s1842_s15 = sld [smem:[#allocation4 + $0xc]] }
  0x86   : > { %s1844_s4 = sld [smem:[#allocation4 + $0xd]] }
  0x87   : > { %s1846_s13 = sld [smem:[#allocation4 + $0x10]] }
  0x88   : > { %s1864_s7 = sld [smem:[#allocation4 + $0x15]] }
  0x89   : > { %2515 = sst [smem:[#allocation37_spill]] %s1835_s20 }
  0x8a   : > { %2516 = sst [smem:[#allocation38_spill]] %s1837_s21 }
  0x8b   : > { %2517 = sst [smem:[#allocation39_spill]] %s1842_s15 }
  0x8c   : > { %2518 = sst [smem:[#allocation40_spill]] %s1844_s4 }
  0x8d   : > { %2519 = sst [smem:[#allocation41_spill]] %s1846_s13 }
  0x8e   : > { %s1852_s21 = sld [smem:[#allocation4 + $0x11]] }
  0x8f   : > { %s1858_s4 = sld [smem:[#allocation4 + $0x14]] }
  0x90   : > { %s1870_s25 = sld [smem:[#allocation4 + $0x18]] }
  0x91   : > { %s1876_s8 = sld [smem:[#allocation4 + $0x19]] }
  0x92   : > { %s2522_s0 = sld [smem:[#allocation28_spill]] }
  0x93   : > { %s1882_s26 = sld [smem:[#allocation4 + $0x1c]] }
  0x94   : > { %s2524_s1 = sld [smem:[#allocation27_spill]] }
  0x95   : > { %2520 = sst [smem:[#allocation42_spill]] %s1858_s4 }
  0x96   : > { %2521 = sst [smem:[#allocation43_spill]] %s1870_s25 }
  0x97   : > { %s2525_s22 = sld [smem:[#allocation29_spill]] }
  0x98   : > { %s1889_s2 = sld [smem:[#allocation4 + $0x1d]] }
  0x99   : > { %2523 = sst [smem:[#allocation28_spill]] %s1882_s26 }
  0x9a   : > { %s1897_s18 = sld [smem:[#allocation4 + $0x20]] }
  0x9b   : > { %s1907_s12 = sld [smem:[#allocation4 + $0x21]] }
  0x9c   : > { %s2527_s27 = sld [smem:[#allocation30_spill]] }
  0x9d   : > { %s2528_s23 = sld [smem:[#allocation31_spill]] }
  0x9e   : > { %s2529_s9 = sld [smem:[#allocation32_spill]] }
  0x9f   : > { %s1912_s19 = sld [smem:[#allocation4 + $0x24]] }
  0xa0   : > { %2526 = sst [smem:[#allocation27_spill]] %s1897_s18 }
  0xa1   : > { %s2531_s10 = sld [smem:[#allocation33_spill]] }
  0xa2   : > { %s1914_s30 = sld [smem:[#allocation4 + $0x25]] }
  0xa3   : > { %s2534_s6 = sld [smem:[#allocation26_spill]] }
  0xa4   : > { %s1923_s5 = sld [smem:[#allocation4 + $0x29]] }
  0xa5   : > { %2530 = sst [smem:[#allocation29_spill]] %s1912_s19 }
  0xa6   : > { %s1928_s29 = sld [smem:[#allocation4 + $0x2c]] }
  0xac   : > { %2535 = sst [smem:[#allocation31_spill]] %s1928_s29 }
  0xad   : > { %s1991_s29 = sld [smem:[#allocation4 + $0xf]] }
  0xaf   : > { %v542_v27 = vpop.permute.xlu2 %541 }
  0xb0   : > { %v543_v38 = vsel %vm375_vm2, %v542_v27, %v1705_v7  ;;  %v771_v27 = vstv %s1803_s17  ;;  %s2532_s17 = sld [smem:[#allocation34_spill]] }
  0xb7   : > { %v708_v32 = vpop.permute.xlu2 %707 }
  0xb8   : > { %v709_v35 = vsel %vm375_vm2, %v708_v32, %v1708_v9  ;;  %v809_v32 = vstv %s2525_s22  ;;  %s1941_s22 = sld [smem:[#allocation4 + $0x35]] }
  0xbe   : > { %2538 = sst [smem:[#allocation34_spill]] %s1941_s22 }
  0xbf   : > { %s1999_s22 = sld [smem:[#allocation4 + $0x17]] }
  0xd0   : > { %v719_v28 = vpop.permute.xlu1 %718  ;;  %v388_v29 = vpop.permute.xlu0 %387 }
  0xd1   : > { %v389_v30 = vsel %vm375_vm2, %v388_v29, %v1718_v23  ;;  %v720_v31 = vsel %vm375_vm2, %v719_v28, %v1716_v22  ;;  %v1904_v28 = vmul.f32 %v1708_v9, %v775_v14  ;;  %v792_v29 = vstv %s2522_s0  ;;  %s1935_s0 = sld [smem:[#allocation4 + $0x30]] }
  0xd2   : > { %390 = vrot.lane.b32.xlu0 %v389_v30, %s1522_s16  ;;  %721 = vrot.lane.b32.xlu2 %v720_v31, %s1522_s16  ;;  %v788_v31 = vstv %s2524_s1  ;;  %s1939_s1 = sld [smem:[#allocation4 + $0x34]] }
  0xd7   : > { %2536 = sst [smem:[#allocation32_spill]] %s1935_s0 }
  0xd8   : > { %v377_v33 = vpop.permute.xlu1 %376  ;;  %v553_v34 = vpop.permute.xlu0 %552  ;;  %2537 = sst [smem:[#allocation33_spill]] %s1939_s1 }
  0xd9   : > { %v378_v36 = vsel %vm375_vm2, %v377_v33, %v1710_v10  ;;  %v554_v37 = vsel %vm375_vm2, %v553_v34, %v1727_v26  ;;  %s2548_s1 = sld [smem:[#allocation36_spill]] }
  0xda   : > { %379 = vrot.lane.b32.xlu0 %v378_v36, %s1522_s16  ;;  %555 = vrot.lane.b32.xlu1 %v554_v37, %s1522_s16  ;;  %s1985_s0 = sld [smem:[#allocation4 + $0xb]] }
  0xdb   : > { %710 = vrot.lane.b32.xlu2 %v709_v35, %s1522_s16 }
  0xe2   : > { %544 = vrot.lane.b32.xlu1 %v543_v38, %s1522_s16  ;;  %s1787_s16 = sld [smem:[#allocation4 + $0x58]] }
  0xe8   : > { %v832_v0 = vstv %s1787_s16  ;;  %s1930_s16 = sld [smem:[#allocation4 + $0x2d]] }
 0x12c   : > { %v722_v39 = vpop.permute.xlu2 %721 }
 0x12d   : > { %v723_v40 = vsel %vm375_vm2, %v722_v39, %v1716_v22 }
 0x12e   : > { %725 = vrot.lane.b32.xlu2 %v723_v40, %s1523_s14  ;;  %v793_v40 = vmul.f32 %v1708_v9, %v792_v29  ;;  %v416_v29 = vstv %s1831_s11 }
 0x135   : > { %v711_v41 = vpop.permute.xlu2 %710 }
 0x136   : > { %v712_v42 = vsel %vm375_vm2, %v711_v41, %v1708_v9  ;;  %v810_v41 = vmul.f32 %v1708_v9, %v809_v32  ;;  %v450_v32 = vstv %s1842_s15 }
 0x137   : > { %714 = vrot.lane.b32.xlu2 %v712_v42, %s1523_s14  ;;  %v822_v42 = vstv %s2527_s27  ;;  %s1945_s27 = sld [smem:[#allocation4 + $0x38]] }
 0x13d   : > { %2539 = sst [smem:[#allocation44_spill]] %s1945_s27 }
 0x13e   : > { %s1973_s27 = sld [smem:[#allocation4 + $0x6]] }
 0x13f   : > { %s2565_s15 = sld [smem:[#allocation44_spill]] }
 0x144   : > { %v391_v43 = vpop.permute.xlu0 %390 }
 0x145   : > { %v392_v44 = vsel %vm375_vm2, %v391_v43, %v1718_v23  ;;  %v826_v43 = vstv %s2528_s23  ;;  %s1950_s23 = sld [smem:[#allocation4 + $0x39]] }
 0x146   : > { %394 = vrot.lane.b32.xlu0 %v392_v44, %s1523_s14  ;;  %v839_v44 = vstv %s2529_s9  ;;  %s1953_s9 = sld [smem:[#allocation4 + $0x3c]] }
 0x14b   : > { %2540 = sst [smem:[#allocation45_spill]] %s1950_s23 }
 0x14c   : > { %v556_v45 = vpop.permute.xlu1 %555  ;;  %v380_v46 = vpop.permute.xlu0 %379  ;;  %2541 = sst [smem:[#allocation46_spill]] %s1953_s9 }
 0x14d   : > { %v557_v47 = vsel %vm375_vm2, %v556_v45, %v1727_v26  ;;  %v381_v48 = vsel %vm375_vm2, %v380_v46, %v1710_v10  ;;  %v843_v46 = vstv %s2531_s10  ;;  %s1965_s9 = sld [smem:[#allocation4 + $0x2]] }
 0x14e   : > { %559 = vrot.lane.b32.xlu1 %v557_v47, %s1523_s14  ;;  %383 = vrot.lane.b32.xlu0 %v381_v48, %s1523_s14  ;;  %v856_v47 = vstv %s1823_s28  ;;  %v860_v48 = vstv %s2532_s17  ;;  %s1937_s28 = sld [smem:[#allocation4 + $0x31]] }
 0x14f   : > { %s1961_s17 = sld [smem:[#allocation4 + $0x3d]] }
 0x150   : > { %s2553_s23 = sld [smem:[#allocation40_spill]] }
 0x153   : > { %2544 = sst [smem:[#allocation49_spill]] %s1965_s9 }
 0x154   : > { %v545_v49 = vpop.permute.xlu1 %544  ;;  %s1981_s9 = sld [smem:[#allocation4 + $0xa]] }
 0x155   : > { %v546_v50 = vsel %vm375_vm2, %v545_v49, %v1705_v7  ;;  %2543 = sst [smem:[#allocation48_spill]] %s1961_s17 }
 0x156   : > { %548 = vrot.lane.b32.xlu1 %v546_v50, %s1523_s14  ;;  %s1789_s14 = sld [smem:[#allocation4 + $0x59]] }
 0x157   : > { %s1977_s17 = sld [smem:[#allocation4 + $0x7]] }
 0x15a   : > { %2550 = sst [smem:[#allocation51_spill]] %s1981_s9 }
 0x15b   : > { %s1997_s9 = sld [smem:[#allocation4 + $0x16]] }
 0x15c   : > { %v835_v1 = vstv %s1789_s14  ;;  %s1283_s14 = smul.u32 144, %s2534_s6  ;;  %s2546_s6 = sld [smem:[#allocation35_spill]] }
 0x15d   : > { %v836_v18 = vmul.f32 %v835_v1, %v1716_v22  ;;  %v805_v22 = vstv %s1811_s24  ;;  %s1917_s24 = sld [smem:[#allocation4 + $0x28]] }
 0x15e   : > { %s1957_s10 = scalar_lea.vmem [#allocation8], %s1283_s14  ;;  %s1969_s14 = sld [smem:[#allocation4 + $0x3]] }
 0x15f   : > { %2542 = sst [smem:[#allocation47_spill]] %s1957_s10 }
 0x160   : > { %2547 = sst [smem:[#allocation35_spill]] %s1973_s27 }
 0x161   : > { %2549 = sst [smem:[#allocation36_spill]] %s1977_s17 }
 0x162   : > { %s1989_s27 = sld [smem:[#allocation4 + $0xe]] }
 0x163   : > { %2533 = sst [smem:[#allocation30_spill]] %s1917_s24 }
 0x164   : > { %2545 = sst [smem:[#allocation50_spill]] %s1969_s14 }
 0x165   : > { %s2551_s14 = sld [smem:[#allocation38_spill]] }
 0x166   : > { %2552 = sst [smem:[#allocation38_spill]] %s1985_s0 }
 0x167   : > { %s1993_s17 = sld [smem:[#allocation4 + $0x12]] }
 0x168   : > { %s1995_s24 = sld [smem:[#allocation4 + $0x13]] }
 0x169   : > { %s2001_s0 = sld [smem:[#allocation4 + $0x1a]] }
 0x16d   : > { %2554 = sst [smem:[#allocation40_spill]] %s1993_s17 }
 0x16e   : > { %s2011_s17 = sld [smem:[#allocation4 + $0x1e]] }
 0x16f   : > { %2555 = sst [smem:[#allocation52_spill]] %s2001_s0 }
 0x170   : > { %s2017_s0 = sld [smem:[#allocation4 + $0x1f]] }
 0x188   : > { %v726_v8 = vpop.permute.xlu2 %725 }
 0x189   : > { %v728_v15 = vsel %vm364_vm3, 0.0, %v726_v8  ;;  %v827_v8 = vmul.f32 %v1708_v9, %v826_v43 }
 0x18a   : > { %v731_v30 = vmul.f32 %v730_v52, %v728_v15  ;;  %v748_v33 = vmul.f32 %v747_v54, %v728_v15  ;;  %v765_v34 = vmul.f32 %v764_v56, %v728_v15  ;;  %v782_v35 = vmul.f32 %v781_v58, %v728_v15 }
 0x18b   : > { %v799_v36 = vmul.f32 %v798_v60, %v728_v15  ;;  %v816_v37 = vmul.f32 %v815_v62, %v728_v15  ;;  %v833_v38 = vmul.f32 %v832_v0, %v728_v15  ;;  %v850_v39 = vmul.f32 %v849_v2, %v728_v15 }
 0x18c   : > { %v735_v45 = vadd.f32 %v734_v4, %v731_v30  ;;  %v752_v49 = vadd.f32 %v751_v5, %v748_v33  ;;  %v769_v50 = vadd.f32 %v768_v11, %v765_v34  ;;  %v786_v52 = vadd.f32 %v785_v12, %v782_v35 }
 0x18d   : > { %v803_v53 = vadd.f32 %v802_v16, %v799_v36  ;;  %v820_v55 = vadd.f32 %v819_v17, %v816_v37  ;;  %v837_v56 = vadd.f32 %v836_v18, %v833_v38  ;;  %v854_v57 = vadd.f32 %v853_v19, %v850_v39 }
 0x18e   : > { %v844_v11 = vmul.f32 %v1708_v9, %v843_v46  ;;  %v861_v18 = vmul.f32 %v1708_v9, %v860_v48  ;;  %v419_v30 = vstv %s1833_s3  ;;  %v453_v33 = vstv %s2553_s23  ;;  %s2033_s3 = sld [smem:[#allocation4 + $0x23]] }
 0x18f   : > { %v467_v34 = vstv %s1846_s13  ;;  %v470_v35 = vstv %s1852_s21  ;;  %v484_v36 = vstv %s1858_s4  ;;  %v487_v37 = vstv %s1864_s7  ;;  %s2556_s21 = sld [smem:[#allocation34_spill]] }
 0x190   : > { %v501_v38 = vstv %s1870_s25  ;;  %v504_v39 = vstv %s1876_s8  ;;  %v2031_v43 = vmul.f32 %v419_v30, %v1718_v23  ;;  %v567_v46 = vstv %s1907_s12  ;;  %s2043_s7 = sld [smem:[#allocation4 + $0x26]] }
 0x191   : > { %v715_v54 = vpop.permute.xlu2 %714  ;;  %s2557_s8 = sld [smem:[#allocation30_spill]]  ;;  %v2046_v48 = vmul.f32 %v470_v35, %v1718_v23  ;;  %v528_v35 = vstv %s2017_s0 }
 0x192   : > { %v717_v58 = vsel %vm364_vm3, 0.0, %v715_v54  ;;  %s2559_s23 = sld [smem:[#allocation45_spill]]  ;;  %v564_v54 = vstv %s1897_s18 }
 0x193   : > { %v738_v59 = vmul.f32 %v737_v20, %v717_v58  ;;  %v755_v60 = vmul.f32 %v754_v24, %v717_v58  ;;  %v772_v61 = vmul.f32 %v771_v27, %v717_v58  ;;  %v789_v62 = vmul.f32 %v788_v31, %v717_v58  ;;  %s2560_s12 = sld [smem:[#allocation32_spill]] }
 0x194   : > { %v806_v63 = vmul.f32 %v805_v22, %v717_v58  ;;  %v823_v0 = vmul.f32 %v822_v42, %v717_v58  ;;  %v840_v1 = vmul.f32 %v839_v44, %v717_v58  ;;  %v857_v2 = vmul.f32 %v856_v47, %v717_v58  ;;  %s2063_s25 = sld [smem:[#allocation4 + $0x2a]] }
 0x195   : > { %v739_v3 = vadd.f32 %v738_v59, %v735_v45  ;;  %v756_v4 = vadd.f32 %v755_v60, %v752_v49  ;;  %v773_v5 = vadd.f32 %v772_v61, %v769_v50  ;;  %v790_v6 = vadd.f32 %v789_v62, %v786_v52  ;;  %s2564_s4 = sld [smem:[#allocation36_spill]] }
 0x196   : > { %v807_v12 = vadd.f32 %v806_v63, %v803_v53  ;;  %v824_v13 = vadd.f32 %v823_v0, %v820_v55  ;;  %v841_v17 = vadd.f32 %v840_v1, %v837_v56  ;;  %v858_v20 = vadd.f32 %v857_v2, %v854_v57  ;;  %s2073_s13 = sld [smem:[#allocation4 + $0x2b]] }
 0x197   : > { %v743_v14 = vadd.f32 %v1894_v21, %v739_v3  ;;  %v760_v15 = vadd.f32 %v1900_v25, %v756_v4  ;;  %v777_v16 = vadd.f32 %v1904_v28, %v773_v5  ;;  %v794_v19 = vadd.f32 %v793_v40, %v790_v6  ;;  %s2081_s18 = sld [smem:[#allocation4 + $0x2e]] }
 0x198   : > { %v811_v21 = vadd.f32 %v810_v41, %v807_v12  ;;  %v828_v9 = vadd.f32 %v827_v8, %v824_v13  ;;  %v845_v24 = vadd.f32 %v844_v11, %v841_v17  ;;  %v862_v25 = vadd.f32 %v861_v18, %v858_v20 }
 0x199   : > { %1236 = vst.msk [vmem:[%s1957_s10 + $0x50] sm:$0xff] %vm413_vm4, %v743_v14  ;;  %v399_v27 = vstv %s2546_s6  ;;  %v402_v28 = vstv %s2548_s1  ;;  %v433_v31 = vstv %s1835_s20  ;;  %s2023_s1 = sld [smem:[#allocation4 + $0x22]]  ;;  %v2039_v45 = vmul.f32 %v453_v33, %v1718_v23 }
 0x19a   : > { %1241 = vst.msk [vmem:[%s1957_s10 + $0x58] sm:$0xff] %vm413_vm4, %v760_v15  ;;  %v436_v22 = vstv %s2551_s14  ;;  %v517_v40 = vstv %s1882_s26  ;;  %v520_v41 = vstv %s1889_s2  ;;  %v2028_v42 = vmul.f32 %v402_v28, %v1718_v23  ;;  %s2558_s2 = sld [smem:[#allocation31_spill]] }
 0x19b   : > { %1246 = vst.msk [vmem:[%s1957_s10 + $0x60] sm:$0xff] %vm413_vm4, %v777_v16  ;;  %v2036_v44 = vmul.f32 %v436_v22, %v1718_v23  ;;  %v584_v47 = vstv %s1914_s30  ;;  %v2049_v49 = vmul.f32 %v487_v37, %v1718_v23  ;;  %v2052_v50 = vmul.f32 %v504_v39, %v1718_v23  ;;  %s2055_s14 = sld [smem:[#allocation4 + $0x27]] }
 0x19c   : > { %1251 = vst.msk [vmem:[%s1957_s10 + $0x68] sm:$0xff] %vm413_vm4, %v794_v19  ;;  %v601_v52 = vstv %s1923_s5  ;;  %v2058_v53 = vmul.f32 %v520_v41, %v1718_v23  ;;  %s2561_s30 = sld [smem:[#allocation33_spill]]  ;;  %v581_v55 = vstv %s1912_s19  ;;  %v618_v56 = vstv %s1930_s16 }
 0x19d   : > { %1256 = vst.msk [vmem:[%s1957_s10 + $0x70] sm:$0xff] %vm413_vm4, %v811_v21  ;;  %s2562_s26 = sld [smem:[#allocation48_spill]]  ;;  %v2066_v57 = vmul.f32 %v567_v46, %v1727_v26  ;;  %v2069_v58 = vmul.f32 %v584_v47, %v1727_v26  ;;  %v635_v59 = vstv %s1937_s28  ;;  %v652_v60 = vstv %s2556_s21 }
 0x19e   : > { %1261 = vst.msk [vmem:[%s1957_s10 + $0x78] sm:$0xff] %vm413_vm4, %v828_v9  ;;  %s2563_s5 = sld [smem:[#allocation50_spill]]  ;;  %v598_v23 = vstv %s2557_s8  ;;  %v2077_v61 = vmul.f32 %v601_v52, %v1727_v26  ;;  %v669_v63 = vstv %s2559_s23  ;;  %v2084_v0 = vmul.f32 %v618_v56, %v1727_v26 }
 0x19f   : > { %1266 = vst.msk [vmem:[%s1957_s10 + $0x80] sm:$0xff] %vm413_vm4, %v845_v24  ;;  %s2566_s16 = sld [smem:[#allocation46_spill]]  ;;  %v632_v1 = vstv %s2560_s12  ;;  %v2092_v4 = vmul.f32 %v635_v59, %v1727_v26  ;;  %v2095_v5 = vmul.f32 %v652_v60, %v1727_v26  ;;  %v427_v8 = vstv %s2564_s4 }
 0x1a0   : > { %1271 = vst.msk [vmem:[%s1957_s10 + $0x88] sm:$0xff] %vm413_vm4, %v862_v25  ;;  %s2005_s10 = sld [smem:[#allocation4 + $0x1b]]  ;;  %v615_v62 = vstv %s2558_s2  ;;  %v666_v11 = vstv %s2565_s15  ;;  %v2103_v12 = vmul.f32 %v669_v63, %v1727_v26  ;;  %v461_v18 = vstv %s1991_s29 }
 0x1a1   : > { %s2567_s19 = sld [smem:[#allocation38_spill]]  ;;  %v2121_v20 = vmul.f32 %v427_v8, %v1710_v10  ;;  %v478_v21 = vstv %s1995_s24  ;;  %v495_v9 = vstv %s1999_s22  ;;  %v457_v25 = vstv %s1989_s27 }
 0x1a2   : > { %s2568_s20 = sld [smem:[#allocation49_spill]]  ;;  %v649_v2 = vstv %s2561_s30  ;;  %v2136_v30 = vmul.f32 %v461_v18, %v1710_v10  ;;  %v2144_v39 = vmul.f32 %v478_v21, %v1710_v10  ;;  %v2147_v41 = vmul.f32 %v495_v9, %v1710_v10 }
 0x1a3   : > { %s2569_s28 = sld [smem:[#allocation35_spill]]  ;;  %v686_v3 = vstv %s2562_s26  ;;  %v575_v46 = vstv %s2033_s3  ;;  %v592_v47 = vstv %s2055_s14  ;;  %v609_v60 = vstv %s2073_s13 }
 0x1a4   : > { %s2089_s21 = sld [smem:[#allocation4 + $0x2f]]  ;;  %v410_v6 = vstv %s2563_s5  ;;  %v2110_v15 = vmul.f32 %v686_v3, %v1727_v26  ;;  %v524_v63 = vstv %s2011_s17  ;;  %v2162_v3 = vmul.f32 %v528_v35, %v1710_v10 }
 0x1a5   : > { %s2099_s23 = sld [smem:[#allocation4 + $0x32]]  ;;  %v683_v13 = vstv %s2566_s16  ;;  %v2118_v19 = vmul.f32 %v410_v6, %v1710_v10  ;;  %v2170_v18 = vmul.f32 %v1705_v7, %v592_v47 }
 0x1a6   : > { %s2570_s2 = sld [smem:[#allocation51_spill]]  ;;  %v512_v28 = vstv %s2005_s10 }
 0x1a7   : > { %v444_v14 = vstv %s2567_s19  ;;  %s2107_s26 = sld [smem:[#allocation4 + $0x33]]  ;;  %v2157_v59 = vmul.f32 %v512_v28, %v1710_v10 }
 0x1a8   : > { %s2571_s30 = sld [smem:[#allocation40_spill]]  ;;  %v406_v16 = vstv %s2568_s20  ;;  %v2129_v24 = vmul.f32 %v444_v14, %v1710_v10  ;;  %v2167_v14 = vmul.f32 %v1705_v7, %v575_v46  ;;  %v2177_v10 = vmul.f32 %v1705_v7, %v609_v60 }
 0x1a9   : > { %v423_v17 = vstv %s2569_s28  ;;  %s2115_s4 = sld [smem:[#allocation4 + $0x36]] }
 0x1aa   : > { %s2125_s19 = sld [smem:[#allocation4 + $0x37]]  ;;  %v626_v9 = vstv %s2089_s21 }
 0x1ab   : > { %s2572_s5 = sld [smem:[#allocation52_spill]]  ;;  %v2191_v33 = vmul.f32 %v1705_v7, %v626_v9  ;;  %v2592_v51 = vstv %s2099_s23 }
 0x1ac   : > { %v440_v26 = vstv %s2570_s2  ;;  %s2133_s29 = sld [smem:[#allocation4 + $0x3a]] }
 0x1ad   : > { %s2141_s24 = sld [smem:[#allocation4 + $0x3b]] }
 0x1ae   : > { %s2151_s22 = sld [smem:[#allocation4 + $0x3e]] }
 0x1af   : > { %s2584_s8 = sld [smem:[#allocation16_spill]] }
 0x1b0   : > { %s2251_s15 = sld [smem:[#allocation4 + $0x3f]] }
 0x1b1   : > { %v508_v56 = vstv %s2572_s5  ;;  %s2587_s2 = sld [smem:[#allocation15_spill]] }
 0x1b2   : > { %v673_v9 = vstv %s2133_s29  ;;  %s2597_s12 = sld [smem:[#allocation56_spill]] }
 0x1b5   : > { %s1284_s20 = smul.u32 12, %s2584_s8 }
 0x1b8   : > { %v395_v37 = vpop.permute.xlu0 %394  ;;  %s1424_s10 = scalar_lea.hbm %s2597_s12, 192 }
 0x1b9   : > { %v397_v52 = vsel %vm364_vm3, 0.0, %v395_v37  ;;  %v643_v37 = vstv %s2107_s26  ;;  %s2583_s26 = sld [smem:[#allocation26_spill]] }
 0x1ba   : > { %v400_v28 = vmul.f32 %v399_v27, %v397_v52  ;;  %v417_v8 = vmul.f32 %v416_v29, %v397_v52  ;;  %v434_v46 = vmul.f32 %v433_v31, %v397_v52  ;;  %v451_v47 = vmul.f32 %v450_v32, %v397_v52 }
 0x1bb   : > { %v468_v21 = vmul.f32 %v467_v34, %v397_v52  ;;  %v485_v35 = vmul.f32 %v484_v36, %v397_v52  ;;  %v502_v29 = vmul.f32 %v501_v38, %v397_v52  ;;  %v518_v31 = vmul.f32 %v517_v40, %v397_v52 }
 0x1bc   : > { %v2202_v22 = vmul.f32 %v1705_v7, %v643_v37  ;;  %v404_v32 = vadd.f32 %v2028_v42, %v400_v28  ;;  %v690_v27 = vstv %s2151_s22  ;;  %v421_v36 = vadd.f32 %v2031_v43, %v417_v8 }
 0x1bd   : > { %v438_v38 = vadd.f32 %v2036_v44, %v434_v46  ;;  %v455_v40 = vadd.f32 %v2039_v45, %v451_v47  ;;  %v472_v42 = vadd.f32 %v2046_v48, %v468_v21  ;;  %v489_v43 = vadd.f32 %v2049_v49, %v485_v35 }
 0x1be   : > { %v506_v44 = vadd.f32 %v2052_v50, %v502_v29  ;;  %v522_v45 = vadd.f32 %v2058_v53, %v518_v31  ;;  %v2585_v35 = vstv %s2571_s30  ;;  %v2586_v46 = vstv %s1997_s9  ;;  %s2272_s9 = sadd.s32 %s2587_s2, %s1284_s20 }
 0x1bf   : > { %s1282_s0 = smul.u32 48, %s2583_s26 }
 0x1c0   : > { %v560_v34 = vpop.permute.xlu1 %559  ;;  %v384_v6 = vpop.permute.xlu0 %383 }
 0x1c1   : > { %v562_v52 = vsel %vm364_vm3, 0.0, %v560_v34  ;;  %v386_v48 = vsel %vm364_vm3, 0.0, %v384_v6  ;;  %s2262_s27 = scalar_lea.vmem [#allocation7], %s1282_s0 }
 0x1c2   : > { %v565_v28 = vmul.f32 %v564_v54, %v562_v52  ;;  %v582_v37 = vmul.f32 %v581_v55, %v562_v52  ;;  %v599_v60 = vmul.f32 %v598_v23, %v562_v52  ;;  %v616_v54 = vmul.f32 %v615_v62, %v562_v52  ;;  %s883_s16 = sshll.u32 %s2262_s27, 4  ;;  %s884_s16 = int_to_ptr.vmem [resolvable:$true] %s883_s16 }
 0x1c3   : > { %v633_v55 = vmul.f32 %v632_v1, %v562_v52  ;;  %v650_v8 = vmul.f32 %v649_v2, %v562_v52  ;;  %v667_v23 = vmul.f32 %v666_v11, %v562_v52  ;;  %v684_v53 = vmul.f32 %v683_v13, %v562_v52 }
 0x1c4   : > { %v569_v49 = vadd.f32 %v2066_v57, %v565_v28  ;;  %v586_v21 = vadd.f32 %v2069_v58, %v582_v37  ;;  %v603_v50 = vadd.f32 %v2077_v61, %v599_v60  ;;  %v407_v6 = vmul.f32 %v406_v16, %v386_v48 }
 0x1c5   : > { %v424_v62 = vmul.f32 %v423_v17, %v386_v48  ;;  %v441_v1 = vmul.f32 %v440_v26, %v386_v48  ;;  %v458_v2 = vmul.f32 %v457_v25, %v386_v48  ;;  %v475_v11 = vmul.f32 %v2585_v35, %v386_v48 }
 0x1c6   : > { %v492_v57 = vmul.f32 %v2586_v46, %v386_v48  ;;  %v509_v47 = vmul.f32 %v508_v56, %v386_v48  ;;  %v525_v58 = vmul.f32 %v524_v63, %v386_v48  ;;  %v408_v29 = vadd.f32 %v407_v6, %v404_v32 }
 0x1c7   : > { %v425_v61 = vadd.f32 %v424_v62, %v421_v36  ;;  %v442_v60 = vadd.f32 %v441_v1, %v438_v38  ;;  %v459_v31 = vadd.f32 %v458_v2, %v455_v40  ;;  %v476_v13 = vadd.f32 %v475_v11, %v472_v42 }
 0x1c8   : > { %v493_v16 = vadd.f32 %v492_v57, %v489_v43  ;;  %v510_v17 = vadd.f32 %v509_v47, %v506_v44  ;;  %v526_v34 = vadd.f32 %v525_v58, %v522_v45  ;;  %v549_v26 = vpop.permute.xlu1 %548  ;;  %v620_v25 = vadd.f32 %v2084_v0, %v616_v54 }
 0x1c9   : > { %v412_v52 = vadd.f32 %v2118_v19, %v408_v29  ;;  %v429_v56 = vadd.f32 %v2121_v20, %v425_v61  ;;  %v446_v63 = vadd.f32 %v2129_v24, %v442_v60  ;;  %v637_v32 = vadd.f32 %v2092_v4, %v633_v55 }
 0x1ca   : > { %v654_v36 = vadd.f32 %v2095_v5, %v650_v8  ;;  %v463_v38 = vadd.f32 %v2136_v30, %v459_v31  ;;  %v480_v0 = vadd.f32 %v2144_v39, %v476_v13  ;;  %v497_v4 = vadd.f32 %v2147_v41, %v493_v16 }
 0x1cb   : > { %414 = vst.msk [vmem:[%s2262_s27] sm:$0xff] %vm413_vm4, %v412_v52  ;;  %v514_v5 = vadd.f32 %v2157_v59, %v510_v17  ;;  %v530_v19 = vadd.f32 %v2162_v3, %v526_v34  ;;  %v551_v20 = vsel %vm364_vm3, 0.0, %v549_v26  ;;  %v2588_v24 = vstv %s2023_s1  ;;  %s2594_s1 = sld [smem:[#allocation47_spill]] }
 0x1cc   : > { %1158 = vst.msk [vmem:[%s2262_s27 + $0x8] sm:$0xff] %vm413_vm4, %v429_v56  ;;  %v572_v30 = vmul.f32 %v2588_v24, %v551_v20  ;;  %v2589_v39 = vstv %s2043_s7  ;;  %v2590_v42 = vstv %s2063_s25  ;;  %v2591_v28 = vstv %s2081_s18  ;;  %s1272_s25 = sshll.u32 %s2272_s9, 3 }
 0x1cd   : > { %v589_v40 = vmul.f32 %v2589_v39, %v551_v20  ;;  %v606_v41 = vmul.f32 %v2590_v42, %v551_v20  ;;  %v623_v59 = vmul.f32 %v2591_v28, %v551_v20  ;;  %1163 = vst.msk [vmem:[%s2262_s27 + $0x10] sm:$0xff] %vm413_vm4, %v446_v63  ;;  %v640_v3 = vmul.f32 %v2592_v51, %v551_v20  ;;  %s882_s30 = scalar_lea.hbm %s2597_s12, %s1272_s25 }
 0x1ce   : > { %v2593_v37 = vstv %s2115_s4  ;;  %v674_v44 = vmul.f32 %v673_v9, %v551_v20  ;;  %v691_v45 = vmul.f32 %v690_v27, %v551_v20  ;;  %1168 = vst.msk [vmem:[%s2262_s27 + $0x18] sm:$0xff] %vm413_vm4, %v463_v38  ;;  %v573_v48 = vadd.f32 %v572_v30, %v569_v49  ;;  %s885_s28 = sshll.u32 %s882_s30, 4  ;;  %s866_s4 = scalar_lea.sflag [#allocation5], %s2583_s26  ;;  %s886_s28 = int_to_ptr.hbm [resolvable:$true] %s885_s28 }
 0x1cf   : > { %v657_v43 = vmul.f32 %v2593_v37, %v551_v20  ;;  %v590_v54 = vadd.f32 %v589_v40, %v586_v21  ;;  %v607_v55 = vadd.f32 %v606_v41, %v603_v50  ;;  %v624_v8 = vadd.f32 %v623_v59, %v620_v25  ;;  %1173 = vst.msk [vmem:[%s2262_s27 + $0x20] sm:$0xff] %vm413_vm4, %v480_v0 }
 0x1d0   : > { %v671_v6 = vadd.f32 %v2103_v12, %v667_v23  ;;  %v2595_v62 = vstv %s2125_s19  ;;  %v694_v9 = vstv %s2251_s15  ;;  %v641_v27 = vadd.f32 %v640_v3, %v637_v32  ;;  %1178 = vst.msk [vmem:[%s2262_s27 + $0x28] sm:$0xff] %vm413_vm4, %v497_v4  ;;  %s1418_s19 = sshra.s32 %s886_s28, 4  ;;  %s1419_s19 = int_to_ptr.hbm [resolvable:$true] %s1418_s19 }
 0x1d1   : > { %v661_v1 = vmul.f32 %v1705_v7, %v2595_v62  ;;  %v688_v2 = vadd.f32 %v2110_v15, %v684_v53  ;;  %v577_v49 = vadd.f32 %v2167_v14, %v573_v48  ;;  %v594_v21 = vadd.f32 %v2170_v18, %v590_v54  ;;  %515 = vst.msk [vmem:[%s2594_s1] sm:$0xff] %vm413_vm4, %v514_v5  ;;  %s1420_s29 = scalar_lea.hbm %s1419_s19, 48  ;;  %p1425_p12 = scmp.lt.s32.totalorder %s1419_s19, %s2597_s12 }
 0x1d2   : > { %v658_v50 = vadd.f32 %v657_v43, %v654_v36  ;;  %v2596_v12 = vstv %s2141_s24  ;;  %v611_v35 = vadd.f32 %v2177_v10, %v607_v55  ;;  %v675_v11 = vadd.f32 %v674_v44, %v671_v6  ;;  %1187 = vst.msk [vmem:[%s2594_s1 + $0x8] sm:$0xff] %vm413_vm4, %v530_v19  ;;  %p1421_p7 = scmp.ne.s32.totalorder %s1419_s19, %s1420_s29  ;;  %p1426_p0 = scmp.lt.s32.totalorder %s1424_s10, %s1420_s29 }
 0x1d3   : > { %v678_v23 = vmul.f32 %v1705_v7, %v2596_v12  ;;  %v695_v15 = vmul.f32 %v1705_v7, %v694_v9  ;;  %v628_v14 = vadd.f32 %v2191_v33, %v624_v8  ;;  %v692_v18 = vadd.f32 %v691_v45, %v688_v2  ;;  %1194 = vst.msk [vmem:[%s2594_s1 + $0x10] sm:$0xff] %vm413_vm4, %v577_v49 }
 0x1d4   : > { %v645_v10 = vadd.f32 %v2202_v22, %v641_v27  ;;  %1199 = vst.msk [vmem:[%s2594_s1 + $0x18] sm:$0xff] %vm413_vm4, %v594_v21  ;;  %v662_v53 = vadd.f32 %v661_v1, %v658_v50  ;;  %p1422_p9 = pnand %p1421_p7, %p1647_p11  ;;  %p1427_p2 = por %p1426_p0, %p1425_p12 }
 0x1d5   : > { %1204 = vst.msk [vmem:[%s2594_s1 + $0x20] sm:$0xff] %vm413_vm4, %v611_v35  ;;  %v679_v7 = vadd.f32 %v678_v23, %v675_v11  ;;  %v696_v33 = vadd.f32 %v695_v15, %v692_v18 }
 0x1d6   : > { %1209 = vst.msk [vmem:[%s2594_s1 + $0x28] sm:$0xff] %vm413_vm4, %v628_v14  ;;  %p1423_p10 = pneg %p1422_p9 }
 0x1d7   : > { %1214 = vst.msk [vmem:[%s2594_s1 + $0x30] sm:$0xff] %vm413_vm4, %v645_v10 }
 0x1d8   : > { %1219 = vst.msk [vmem:[%s2594_s1 + $0x38] sm:$0xff] %vm413_vm4, %v662_v53  ;;  %p1428_p4 = pnand %p1427_p2, %p1423_p10 }
 0x1d9   : > { %1224 = vst.msk [vmem:[%s2594_s1 + $0x40] sm:$0xff] %vm413_vm4, %v679_v7 }
 0x1da   : > { %1229 = vst.msk [vmem:[%s2594_s1 + $0x48] sm:$0xff] %vm413_vm4, %v696_v33 }
 0x1db   : > { %1431 = shalt.err (!%p1428_p4)
}
 0x1dc   : > { %s1524_s5 = smov 128   ;;  %s1525_s13 = smov 256  }
 0x1dd   : > { %s1526_s6 = smov 8   ;;  %894 = sbr.rel (!%p1647_p11) target bundleno = 508 (0x1fc), region = 120 }
 0x1de   : > { %1290 = dma.vmem_to_hbm [thread:$0]  (%p1647_p11), %s884_s16, 768, %s886_s28, %s866_s4, %s1524_s5, %s1525_s13, %s1526_s6  }
 0x1df   : > { %s2599_s11 = sld [smem:[#allocation16_spill]] (%p1647_p11) }
 0x1e0   : > { %s2600_s17 = sld [smem:[#allocation15_spill]] (%p1647_p11) }
 0x1e1   : > { %s2601_s21 = sld [smem:[#allocation47_spill]] (%p1647_p11) }
 0x1e2   : > { %s2602_s2 = sld [smem:[#allocation57_spill]] }
 0x1e5   : > { %s1285_s26 = smul.u32 36, %s2599_s11 }
 0x1e7   : > { %s896_s8 = sadd.s32 %s2600_s17, %s1285_s26  ;;  %v961_v22 = vld [vmem:[%s2601_s21] sm:$0xff]  ;;  %v963_v46 = vld [vmem:[%s2601_s21 + $0x8] sm:$0xff]  ;;  %v965_v57 = vld [vmem:[%s2601_s21 + $0x10] sm:$0xff] }
 0x1e8   : > { %s1273_s0 = sshll.u32 %s896_s8, 3  ;;  %v967_v47 = vld [vmem:[%s2601_s21 + $0x18] sm:$0xff]  ;;  %v969_v58 = vld [vmem:[%s2601_s21 + $0x20] sm:$0xff]  ;;  %v971_v29 = vld [vmem:[%s2601_s21 + $0x28] sm:$0xff] }
 0x1e9   : > { %s2360_s27 = scalar_lea.vmem %s2602_s2, %s1273_s0  ;;  %v973_v61 = vld [vmem:[%s2601_s21 + $0x30] sm:$0xff]  ;;  %v975_v60 = vld [vmem:[%s2601_s21 + $0x38] sm:$0xff]  ;;  %v977_v31 = vld [vmem:[%s2601_s21 + $0x40] sm:$0xff] }
 0x1ea   : > { %962 = vst [vmem:[%s2360_s27] sm:$0xff] %v961_v22  ;;  %v979_v13 = vld [vmem:[%s2601_s21 + $0x48] sm:$0xff]  ;;  %v981_v16 = vld [vmem:[%s2601_s21 + $0x50] sm:$0xff]  ;;  %v983_v17 = vld [vmem:[%s2601_s21 + $0x58] sm:$0xff] }
 0x1eb   : > { %964 = vst [vmem:[%s2360_s27 + $0x10] sm:$0xff] %v963_v46  ;;  %v985_v34 = vld [vmem:[%s2601_s21 + $0x60] sm:$0xff]  ;;  %v987_v26 = vld [vmem:[%s2601_s21 + $0x68] sm:$0xff]  ;;  %v989_v25 = vld [vmem:[%s2601_s21 + $0x70] sm:$0xff] }
 0x1ec   : > { %966 = vst [vmem:[%s2360_s27 + $0x20] sm:$0xff] %v965_v57  ;;  %v991_v52 = vld [vmem:[%s2601_s21 + $0x78] sm:$0xff]  ;;  %v993_v56 = vld [vmem:[%s2601_s21 + $0x80] sm:$0xff]  ;;  %v995_v63 = vld [vmem:[%s2601_s21 + $0x88] sm:$0xff] }
 0x1ed   : > { %968 = vst [vmem:[%s2360_s27 + $0x30] sm:$0xff] %v967_v47 }
 0x1ee   : > { %970 = vst [vmem:[%s2360_s27 + $0x40] sm:$0xff] %v969_v58 }
 0x1ef   : > { %972 = vst [vmem:[%s2360_s27 + $0x50] sm:$0xff] %v971_v29 }
 0x1f0   : > { %974 = vst [vmem:[%s2360_s27 + $0x60] sm:$0xff] %v973_v61 }
 0x1f1   : > { %976 = vst [vmem:[%s2360_s27 + $0x70] sm:$0xff] %v975_v60 }
 0x1f2   : > { %978 = vst [vmem:[%s2360_s27 + $0x80] sm:$0xff] %v977_v31 }
 0x1f3   : > { %980 = vst [vmem:[%s2360_s27 + $0x90] sm:$0xff] %v979_v13 }
 0x1f4   : > { %982 = vst [vmem:[%s2360_s27 + $0xa0] sm:$0xff] %v981_v16 }
 0x1f5   : > { %984 = vst [vmem:[%s2360_s27 + $0xb0] sm:$0xff] %v983_v17 }
 0x1f6   : > { %986 = vst [vmem:[%s2360_s27 + $0xc0] sm:$0xff] %v985_v34 }
 0x1f7   : > { %988 = vst [vmem:[%s2360_s27 + $0xd0] sm:$0xff] %v987_v26 }
 0x1f8   : > { %990 = vst [vmem:[%s2360_s27 + $0xe0] sm:$0xff] %v989_v25 }
 0x1f9   : > { %992 = vst [vmem:[%s2360_s27 + $0xf0] sm:$0xff] %v991_v52 }
 0x1fa   : > { %994 = vst [vmem:[%s2360_s27 + $0x100] sm:$0xff] %v993_v56 }
 0x1fb   : > { %996 = vst [vmem:[%s2360_s27 + $0x110] sm:$0xff] %v995_v63 }
 0x1fc PF: > { %s2603_s9 = sld [smem:[#allocation19_spill]] }
 0x1fd   : > { %s2604_s1 = sld [smem:[#allocation11_spill]] }
 0x202   : > { %p1302_p11 = scmp.ge.s32.totalorder %s2603_s9, 2 }
 0x203   : > { %s1008_s18 = sand.u32 1, %s2604_s1  }
 0x204   : > { %p1297_p5 = pnand %p1302_p11, %p1654_p13  ;;  %s1009_s7 = scalar_lea.sflag [#allocation5], %s1008_s18 }
 0x206   : > { %p1298_p1 = pneg %p1297_p5 }
 0x208   : > { %1477 = dma.done.wait (%p1298_p1), %s1009_s7, 768  }
 0x209   : > { %1479 = vsyncadd (%p1298_p1), %s1009_s7, 4294966528  ;;  %s19_s24 = sadd.s32 1, %s2603_s9   ;;  %s2606_s15 = sld [smem:[#allocation13_spill]] }
 0x20a   : > { %p16_p6 = scmp.ge.s32.totalorder %s19_s24, 6   ;;  %s2607_s16 = sld [smem:[#allocation12_spill]] }
 0x20b   : > { %s2608_s17 = sld [smem:[#allocation24_spill]] }
 0x20c   : > { %s2609_s18 = sld [smem:[#allocation14_spill]] }
 0x20d   : > { %s2610_s19 = sld [smem:[#allocation22_spill]]  ;;  %18 = sbr.rel (!%p16_p6) target bundleno = 13 (0xd), region = 237 }
 0x20e   : > { %s2611_s20 = sld [smem:[#allocation17_spill]] }
 0x20f   : > { %s2612_s21 = sld [smem:[#allocation18_spill]] }
 0x210   : > { %s2613_s22 = sld [smem:[#allocation20_spill]] }
 0x211   : > { %s2614_s23 = sld [smem:[#allocation21_spill]] }
 0x212   :  { %1022 = vsyncpa [#allocation5], 1 }
 0x213   :  { %1024 = vsyncpa [#allocation5 + $0x1], 1 }
 0x214   :  { %1025 = vsyncpa [#allocation6], 1 }
 0x215   :  { %1027 = vsyncpa [#allocation6 + $0x1], 1 }

</bundles_post_ra>
